<compile_context>
chip_gen: v5e
topology: v5e:2x2
jax: 0.10.0
libtpu: 0.0.40
codegen_flags: <defaults>
</compile_context>

<pallas_src>
import jax
import jax.numpy as jnp
from jax import lax
from jax.experimental import pallas as pl
from jax.experimental.pallas import tpu as pltpu

# ------------------------- tiny CLIP-ViT config -------------------------
IMG = 16          # model image size (stand-in for 224)
PATCH = 8
CH = 3
GRID = IMG // PATCH
NPATCH = GRID * GRID
SEQ = NPATCH + 1  # +1 CLS token
HID = 32
HEADS = 2
HEAD_DIM = HID // HEADS
FFN = 64
LAYERS = 2
PROJ = 16         # visual_projection dim
EPS = 1e-5
BATCH = 2
CPP = CH * PATCH * PATCH   # flattened patch length (channel-major: C, P, P)

CLIP_MEAN = jnp.array([0.48145466, 0.4578275, 0.40821073], jnp.float32)
CLIP_STD = jnp.array([0.26862954, 0.26130258, 0.27577711], jnp.float32)

# packed-weight argument order (must match kernel signatures)
WEIGHT_ORDER = ('patch_w', 'tok_bias', 'vecs', 'w_qkv', 'b_qkv', 'w_o',
                'w_fc1', 'b_fc1', 'w_fc2', 'proj_w')

# row layout of the packed 'vecs' array: [4 + 6*LAYERS, HID]
V_PRE_G, V_PRE_B, V_POST_G, V_POST_B = 0, 1, 2, 3
V_PER_LAYER = 6   # per layer: ln1_g, ln1_b, o_b, ln2_g, ln2_b, fc2_b


# ------------------------------- kernels --------------------------------
def _layernorm(x, g, b):
    mu = jnp.mean(x, axis=-1, keepdims=True)
    xc = x - mu
    var = jnp.mean(xc * xc, axis=-1, keepdims=True)
    return xc * lax.rsqrt(var + EPS) * g + b


def _vision_tower(patch_ref, patch_w_ref, tok_ref, vecs_ref, w_qkv_ref, b_qkv_ref,
                  w_o_ref, w_fc1_ref, b_fc1_ref, w_fc2_ref, proj_w_ref):
    """Full CLIP vision tower for the whole batch; returns L2-normalized [B, PROJ]."""
    bs = patch_ref.shape[0] // NPATCH
    total = bs * SEQ

    # --- patch-embed conv (stride=PATCH) as ONE batched matmul ---
    # image-normalize is folded into patch_w / tok_bias at pack time.
    hp = jnp.dot(patch_ref[...], patch_w_ref[...],
                 preferred_element_type=jnp.float32)                 # [bs*NPATCH, HID]
    tok = tok_ref[...]                                               # [SEQ, HID]
    rows = []
    for b in range(bs):
        rows.append(tok[0:1, :])                                     # CLS token row
        rows.append(hp[b * NPATCH:(b + 1) * NPATCH, :] + tok[1:SEQ, :])
    h = jnp.concatenate(rows, axis=0)                                # [bs*SEQ, HID]
    h = _layernorm(h, vecs_ref[V_PRE_G:V_PRE_G + 1, :],
                   vecs_ref[V_PRE_B:V_PRE_B + 1, :])                 # pre_layrnorm

    # block-diagonal additive mask: no cross-image attention (comparisons only,
    # no integer division needed).
    ri = lax.broadcasted_iota(jnp.int32, (total, total), 0)
    ci = lax.broadcasted_iota(jnp.int32, (total, total), 1)
    same = None
    for b in range(bs):
        rin = (ri >= b * SEQ) & (ri < (b + 1) * SEQ)
        cin = (ci >= b * SEQ) & (ci < (b + 1) * SEQ)
        blk = rin & cin
        same = blk if same is None else (same | blk)
    neg = jnp.where(same, 0.0, -1e30).astype(jnp.float32)

    for l in range(LAYERS):
        base = 4 + V_PER_LAYER * l
        # ---------------- self-attention block ----------------
        y = _layernorm(h, vecs_ref[base:base + 1, :], vecs_ref[base + 1:base + 2, :])
        # single fused QKV matmul (query scale pre-folded into the weights/bias)
        qkv = jnp.dot(y, w_qkv_ref[l], preferred_element_type=jnp.float32) + b_qkv_ref[l]
        heads_out = []
        for hd in range(HEADS):
            q = qkv[:, hd * HEAD_DIM:(hd + 1) * HEAD_DIM]
            k = qkv[:, HID + hd * HEAD_DIM:HID + (hd + 1) * HEAD_DIM]
            v = qkv[:, 2 * HID + hd * HEAD_DIM:2 * HID + (hd + 1) * HEAD_DIM]
            s = lax.dot_general(q, k, (((1,), (1,)), ((), ())),
                                preferred_element_type=jnp.float32) + neg   # [T, T]
            s = s - jnp.max(s, axis=-1, keepdims=True)
            e = jnp.exp(s)
            p = e / jnp.sum(e, axis=-1, keepdims=True)                      # exact softmax
            heads_out.append(jnp.dot(p, v, preferred_element_type=jnp.float32))
        o_cat = jnp.concatenate(heads_out, axis=1)                          # [T, HID]
        h = h + jnp.dot(o_cat, w_o_ref[l],
                        preferred_element_type=jnp.float32) + vecs_ref[base + 2:base + 3, :]

        # ---------------- MLP block (quick_gelu) ----------------
        y = _layernorm(h, vecs_ref[base + 3:base + 4, :], vecs_ref[base + 4:base + 5, :])
        f = jnp.dot(y, w_fc1_ref[l], preferred_element_type=jnp.float32) + b_fc1_ref[l]
        f = f * jax.nn.sigmoid(1.702 * f)                                   # quick_gelu
        h = h + jnp.dot(f, w_fc2_ref[l],
                        preferred_element_type=jnp.float32) + vecs_ref[base + 5:base + 6, :]

    # pooled output = post-LN(CLS token rows) -> visual_projection -> L2 normalize
    cls = jnp.concatenate([h[b * SEQ:b * SEQ + 1, :] for b in range(bs)], axis=0)  # [bs, HID]
    pooled = _layernorm(cls, vecs_ref[V_POST_G:V_POST_G + 1, :],
                        vecs_ref[V_POST_B:V_POST_B + 1, :])
    emb = jnp.dot(pooled, proj_w_ref[...], preferred_element_type=jnp.float32)     # [bs, PROJ]
    inv = lax.rsqrt(jnp.sum(emb * emb, axis=-1, keepdims=True) + 1e-12)
    return emb * inv


def clip_embed_kernel(patch_ref, patch_w_ref, tok_ref, vecs_ref, w_qkv_ref, b_qkv_ref,
                      w_o_ref, w_fc1_ref, b_fc1_ref, w_fc2_ref, proj_w_ref, out_ref):
    out_ref[...] = _vision_tower(patch_ref, patch_w_ref, tok_ref, vecs_ref, w_qkv_ref,
                                 b_qkv_ref, w_o_ref, w_fc1_ref, b_fc1_ref, w_fc2_ref,
                                 proj_w_ref)


def clip_loss_kernel(patch_ref, target_ref, patch_w_ref, tok_ref, vecs_ref, w_qkv_ref,
                     b_qkv_ref, w_o_ref, w_fc1_ref, b_fc1_ref, w_fc2_ref, proj_w_ref,
                     loss_ref):
    # tower + nn.CosineEmbeddingLoss(target=+1, 'mean') fused: mean(1 - cos(t, emb)).
    emb = _vision_tower(patch_ref, patch_w_ref, tok_ref, vecs_ref, w_qkv_ref, b_qkv_ref,
                        w_o_ref, w_fc1_ref, b_fc1_ref, w_fc2_ref, proj_w_ref)
    t = target_ref[...]                                                  # [B, PROJ]
    ab = jnp.sum(t * emb, axis=-1, keepdims=True)
    an = jnp.maximum(jnp.sqrt(jnp.sum(t * t, axis=-1, keepdims=True)), 1e-8)
    bn = jnp.maximum(jnp.sqrt(jnp.sum(emb * emb, axis=-1, keepdims=True)), 1e-8)
    cos = ab / (an * bn)                                                 # per-norm eps clamp
    loss_ref[...] = jnp.sum(1.0 - cos, axis=0, keepdims=True) * (1.0 / t.shape[0])


# ----------------------------- parameters --------------------------------
def init_params(key):
    n_keys = 4 + LAYERS * 12
    keys = iter(jax.random.split(key, n_keys))

    def w(shape, scale=0.02):
        return scale * jax.random.normal(next(keys), shape, jnp.float32)

    params = {
        'patch_w': w((CPP, HID)),                  # conv (HID, C, P, P) flattened, no bias
        'class_embed': w((HID,)),
        'pos_embed': w((SEQ, HID)),
        'pre_ln_g': jnp.ones((HID,), jnp.float32),
        'pre_ln_b': jnp.zeros((HID,), jnp.float32),
        'post_ln_g': jnp.ones((HID,), jnp.float32),
        'post_ln_b': jnp.zeros((HID,), jnp.float32),
        'proj_w': w((HID, PROJ)),                  # visual_projection, bias=False
        'layers': [],
    }
    for _ in range(LAYERS):
        params['layers'].append({
            'ln1_g': jnp.ones((HID,), jnp.float32), 'ln1_b': jnp.zeros((HID,), jnp.float32),
            'q_w': w((HID, HID)), 'q_b': w((HID,)),
            'k_w': w((HID, HID)), 'k_b': w((HID,)),
            'v_w': w((HID, HID)), 'v_b': w((HID,)),
            'o_w': w((HID, HID)), 'o_b': w((HID,)),
            'ln2_g': jnp.ones((HID,), jnp.float32), 'ln2_b': jnp.zeros((HID,), jnp.float32),
            'fc1_w': w((HID, FFN)), 'fc1_b': w((FFN,)),
            'fc2_w': w((FFN, HID)), 'fc2_b': w((HID,)),
        })
    return params


def pack_params(params):
    """One-time repack into kernel-friendly, layer-stacked, lane-fused arrays."""
    mean_col = jnp.repeat(CLIP_MEAN, PATCH * PATCH)          # [CPP], (C, P, P) flatten order
    istd_col = 1.0 / jnp.repeat(CLIP_STD, PATCH * PATCH)

    # fold image-normalize into the patch-embed matmul:
    #   ((x - mean) * istd) @ W == x @ (istd[:, None] * W) - (mean * istd) @ W
    patch_w = istd_col[:, None] * params['patch_w']          # [CPP, HID]
    norm_shift = (mean_col * istd_col) @ params['patch_w']   # [HID]

    # token bias: row 0 = class_embed + pos_embed[0] (CLS); rows 1.. = pos_embed[1..]
    # with the normalize shift folded in.
    tok = params['pos_embed'].at[0].add(params['class_embed'])
    tok = tok.at[1:].add(-norm_shift)

    vec_rows = [params['pre_ln_g'], params['pre_ln_b'],
                params['post_ln_g'], params['post_ln_b']]
    for lp in params['layers']:
        vec_rows += [lp['ln1_g'], lp['ln1_b'], lp['o_b'],
                     lp['ln2_g'], lp['ln2_b'], lp['fc2_b']]
    vecs = jnp.stack(vec_rows, axis=0)                       # [4 + 6*LAYERS, HID]

    def stack(name):
        return jnp.stack([lp[name] for lp in params['layers']], axis=0)

    scale = HEAD_DIM ** -0.5                                 # query scale folded into Q cols
    w_qkv = jnp.concatenate([stack('q_w') * scale, stack('k_w'), stack('v_w')],
                            axis=2)                          # [L, HID, 3*HID]
    b_qkv = jnp.concatenate([stack('q_b') * scale, stack('k_b'), stack('v_b')],
                            axis=1).reshape(LAYERS, 1, 3 * HID)

    return {
        'patch_w': patch_w,
        'tok_bias': tok,                                     # [SEQ, HID]
        'vecs': vecs,
        'w_qkv': w_qkv,
        'b_qkv': b_qkv,
        'w_o': stack('o_w'),                                 # [L, HID, HID]
        'w_fc1': stack('fc1_w'),                             # [L, HID, FFN]
        'b_fc1': stack('fc1_b').reshape(LAYERS, 1, FFN),
        'w_fc2': stack('fc2_w'),                             # [L, FFN, HID]
        'proj_w': params['proj_w'],                          # [HID, PROJ]
    }


# --------------------------- forward pipeline -----------------------------
def _extract_patches(x):
    """[B, C, IMG, IMG] NCHW -> [B*NPATCH, CPP] (pure layout plumbing on a ~3 KB tensor)."""
    B = x.shape[0]
    p = x.reshape(B, CH, GRID, PATCH, GRID, PATCH)
    return p.transpose(0, 2, 4, 1, 3, 5).reshape(B * NPATCH, CPP)


def _full_spec(a):
    n = a.ndim
    return pl.BlockSpec(a.shape, lambda i, _n=n: (0,) * _n)


def calc_img_embedding(packed, x):
    """x: [B, C, IMG, IMG] float32 -> L2-normalized [B, PROJ] embedding."""
    B = x.shape[0]
    # i_processor Resize((224,224)) step:
    # TODO(synk): bilinear Resize is not implemented in-kernel; inputs are assumed to
    #             already be at the model resolution so the resize is the identity.
    patches = _extract_patches(x)
    weights = [packed[k] for k in WEIGHT_ORDER]
    return pl.pallas_call(
        clip_embed_kernel,
        grid=(1,),
        in_specs=[_full_spec(patches)] + [_full_spec(w) for w in weights],
        out_specs=pl.BlockSpec((B, PROJ), lambda i: (0, 0)),
        out_shape=jax.ShapeDtypeStruct((B, PROJ), jnp.float32),
        compiler_params=pltpu.CompilerParams(dimension_semantics=("arbitrary",)),
    )(patches, *weights)


def forward(packed, target_embedding, x):
    """CLIPSVTransformerModel.forward: cosine-embedding loss vs the target embedding,
    fully fused into one pallas_call (embedding never leaves VMEM on this path)."""
    patches = _extract_patches(x)
    weights = [packed[k] for k in WEIGHT_ORDER]
    loss = pl.pallas_call(
        clip_loss_kernel,
        grid=(1,),
        in_specs=[_full_spec(patches), _full_spec(target_embedding)]
                 + [_full_spec(w) for w in weights],
        out_specs=pl.BlockSpec((1, 1), lambda i: (0, 0)),
        out_shape=jax.ShapeDtypeStruct((1, 1), jnp.float32),
        compiler_params=pltpu.CompilerParams(dimension_semantics=("arbitrary",)),
    )(patches, target_embedding, *weights)
    return loss[0, 0]


# --------------------------------- main -----------------------------------
if __name__ == "__main__":
    key = jax.random.PRNGKey(0)
    pkey, tkey, xkey = jax.random.split(key, 3)

    # TODO(synk): CLIPModel.from_pretrained checkpoint loading is replaced by
    #             deterministic synthetic weights of the same structure.
    params = init_params(pkey)
    packed = pack_params(params)

    # target image (module __init__) and input image (forward), NCHW in [0, 1]
    target_img = jax.random.uniform(tkey, (BATCH, CH, IMG, IMG), dtype=jnp.float32)
    x = jax.random.uniform(xkey, (BATCH, CH, IMG, IMG), dtype=jnp.float32)

    calc_jit = jax.jit(calc_img_embedding)
    forward_jit = jax.jit(forward)

    # __init__: self.image_embedding = calc_img_embedding(target_img)
    target_embedding = calc_jit(packed, target_img)

    loss = forward_jit(packed, target_embedding, x)
    jax.block_until_ready(loss)
    assert loss.shape == () and bool(jnp.isfinite(loss))
    print("KERNEL_OK")
</pallas_src>

<mosaic_0001>
module attributes {stable_mosaic.version = 11 : i64} {
  func.func @clip_embed_kernel(%arg0: i32, %arg1: memref<8x192xf32, #tpu.memory_space<vmem>>, %arg2: memref<192x32xf32, #tpu.memory_space<vmem>>, %arg3: memref<5x32xf32, #tpu.memory_space<vmem>>, %arg4: memref<16x32xf32, #tpu.memory_space<vmem>>, %arg5: memref<2x32x96xf32, #tpu.memory_space<vmem>>, %arg6: memref<2x1x96xf32, #tpu.memory_space<vmem>>, %arg7: memref<2x32x32xf32, #tpu.memory_space<vmem>>, %arg8: memref<2x32x64xf32, #tpu.memory_space<vmem>>, %arg9: memref<2x1x64xf32, #tpu.memory_space<vmem>>, %arg10: memref<2x64x32xf32, #tpu.memory_space<vmem>>, %arg11: memref<32x16xf32, #tpu.memory_space<vmem>>, %arg12: memref<2x16xf32, #tpu.memory_space<vmem>>) attributes {dimension_semantics = [#tpu.dimension_semantics<arbitrary>], iteration_bounds = array<i64: 1>, scalar_prefetch = 0 : i64, scratch_operands = 0 : i64, tpu.core_type = #tpu.core_type<tc>, window_params = [{pipeline_mode = #tpu.pipeline_mode<synchronous>, transform_indices = @transform_0, window_bounds = array<i64: 8, 192>}, {pipeline_mode = #tpu.pipeline_mode<synchronous>, transform_indices = @transform_1, window_bounds = array<i64: 192, 32>}, {pipeline_mode = #tpu.pipeline_mode<synchronous>, transform_indices = @transform_2, window_bounds = array<i64: 5, 32>}, {pipeline_mode = #tpu.pipeline_mode<synchronous>, transform_indices = @transform_3, window_bounds = array<i64: 16, 32>}, {pipeline_mode = #tpu.pipeline_mode<synchronous>, transform_indices = @transform_4, window_bounds = array<i64: 2, 32, 96>}, {pipeline_mode = #tpu.pipeline_mode<synchronous>, transform_indices = @transform_5, window_bounds = array<i64: 2, 1, 96>}, {pipeline_mode = #tpu.pipeline_mode<synchronous>, transform_indices = @transform_6, window_bounds = array<i64: 2, 32, 32>}, {pipeline_mode = #tpu.pipeline_mode<synchronous>, transform_indices = @transform_7, window_bounds = array<i64: 2, 32, 64>}, {pipeline_mode = #tpu.pipeline_mode<synchronous>, transform_indices = @transform_8, window_bounds = array<i64: 2, 1, 64>}, {pipeline_mode = #tpu.pipeline_mode<synchronous>, transform_indices = @transform_9, window_bounds = array<i64: 2, 64, 32>}, {pipeline_mode = #tpu.pipeline_mode<synchronous>, transform_indices = @transform_10, window_bounds = array<i64: 32, 16>}, {pipeline_mode = #tpu.pipeline_mode<synchronous>, transform_indices = @transform_11, window_bounds = array<i64: 2, 16>}]} {
    %c0 = arith.constant 0 : index
    %c0_0 = arith.constant 0 : index
    %0 = vector.load %arg1[%c0, %c0_0] : memref<8x192xf32, #tpu.memory_space<vmem>>, vector<8x192xf32>
    %c0_1 = arith.constant 0 : index
    %c0_2 = arith.constant 0 : index
    %1 = vector.load %arg2[%c0_1, %c0_2] : memref<192x32xf32, #tpu.memory_space<vmem>>, vector<192x32xf32>
    %cst = arith.constant dense<0.000000e+00> : vector<8x32xf32>
    %2 = tpu.matmul %0, %1, %cst {dimension_numbers = #tpu.dot_dimension_numbers<[1], [0], [0], [1], [0, 0, 1, 1], [], []>} : vector<8x192xf32>, vector<192x32xf32>, vector<8x32xf32> -> vector<8x32xf32>
    %c0_3 = arith.constant 0 : index
    %c0_4 = arith.constant 0 : index
    %3 = vector.load %arg3[%c0_3, %c0_4] : memref<5x32xf32, #tpu.memory_space<vmem>>, vector<5x32xf32>
    %4 = vector.extract_strided_slice %3 {offsets = [0, 0], sizes = [1, 32], strides = [1, 1]} : vector<5x32xf32> to vector<1x32xf32>
    %5 = vector.extract_strided_slice %2 {offsets = [0, 0], sizes = [4, 32], strides = [1, 1]} : vector<8x32xf32> to vector<4x32xf32>
    %6 = vector.extract_strided_slice %3 {offsets = [1, 0], sizes = [4, 32], strides = [1, 1]} : vector<5x32xf32> to vector<4x32xf32>
    %7 = arith.addf %5, %6 : vector<4x32xf32>
    %8 = vector.extract_strided_slice %3 {offsets = [0, 0], sizes = [1, 32], strides = [1, 1]} : vector<5x32xf32> to vector<1x32xf32>
    %9 = vector.extract_strided_slice %2 {offsets = [4, 0], sizes = [4, 32], strides = [1, 1]} : vector<8x32xf32> to vector<4x32xf32>
    %10 = vector.extract_strided_slice %3 {offsets = [1, 0], sizes = [4, 32], strides = [1, 1]} : vector<5x32xf32> to vector<4x32xf32>
    %11 = arith.addf %9, %10 : vector<4x32xf32>
    %12 = tpu.concatenate %4, %7, %8, %11 in 0 : vector<1x32xf32>, vector<4x32xf32>, vector<1x32xf32>, vector<4x32xf32> -> vector<10x32xf32>
    %c0_5 = arith.constant 0 : index
    %c0_6 = arith.constant 0 : index
    %13 = vector.load %arg4[%c0_5, %c0_6] : memref<16x32xf32, #tpu.memory_space<vmem>>, vector<1x32xf32>
    %c1 = arith.constant 1 : index
    %c0_7 = arith.constant 0 : index
    %14 = vector.load %arg4[%c1, %c0_7] : memref<16x32xf32, #tpu.memory_space<vmem>>, vector<1x32xf32>
    %cst_8 = arith.constant dense<0.000000e+00> : vector<10xf32>
    %15 = vector.multi_reduction <add>, %12, %cst_8 [1] : vector<10x32xf32> to vector<10xf32>
    %16 = vector.shape_cast %15 : vector<10xf32> to vector<10x1xf32>
    %cst_9 = arith.constant 3.200000e+01 : f32
    %17 = vector.broadcast %cst_9 : f32 to vector<10x1xf32>
    %18 = arith.divf %16, %17 : vector<10x1xf32>
    %19 = vector.broadcast %18 : vector<10x1xf32> to vector<10x32xf32>
    %20 = arith.subf %12, %19 : vector<10x32xf32>
    %21 = arith.mulf %20, %20 : vector<10x32xf32>
    %cst_10 = arith.constant dense<0.000000e+00> : vector<10xf32>
    %22 = vector.multi_reduction <add>, %21, %cst_10 [1] : vector<10x32xf32> to vector<10xf32>
    %23 = vector.shape_cast %22 : vector<10xf32> to vector<10x1xf32>
    %cst_11 = arith.constant 3.200000e+01 : f32
    %24 = vector.broadcast %cst_11 : f32 to vector<10x1xf32>
    %25 = arith.divf %23, %24 : vector<10x1xf32>
    %cst_12 = arith.constant 9.99999974E-6 : f32
    %26 = vector.broadcast %cst_12 : f32 to vector<10x1xf32>
    %27 = arith.addf %25, %26 : vector<10x1xf32>
    %28 = math.rsqrt %27 : vector<10x1xf32>
    %29 = vector.broadcast %28 : vector<10x1xf32> to vector<10x32xf32>
    %30 = arith.mulf %20, %29 : vector<10x32xf32>
    %31 = vector.broadcast %13 : vector<1x32xf32> to vector<10x32xf32>
    %32 = arith.mulf %30, %31 : vector<10x32xf32>
    %33 = vector.broadcast %14 : vector<1x32xf32> to vector<10x32xf32>
    %34 = arith.addf %32, %33 : vector<10x32xf32>
    %35 = tpu.iota {dimensions = array<i32: 0>} : vector<10x10xi32>
    %36 = tpu.iota {dimensions = array<i32: 1>} : vector<10x10xi32>
    %c0_i32 = arith.constant 0 : i32
    %37 = vector.broadcast %c0_i32 : i32 to vector<10x10xi32>
    %38 = arith.cmpi sge, %35, %37 : vector<10x10xi32>
    %c5_i32 = arith.constant 5 : i32
    %39 = vector.broadcast %c5_i32 : i32 to vector<10x10xi32>
    %40 = arith.cmpi slt, %35, %39 : vector<10x10xi32>
    %41 = arith.andi %38, %40 : vector<10x10xi1>
    %c0_i32_13 = arith.constant 0 : i32
    %42 = vector.broadcast %c0_i32_13 : i32 to vector<10x10xi32>
    %43 = arith.cmpi sge, %36, %42 : vector<10x10xi32>
    %c5_i32_14 = arith.constant 5 : i32
    %44 = vector.broadcast %c5_i32_14 : i32 to vector<10x10xi32>
    %45 = arith.cmpi slt, %36, %44 : vector<10x10xi32>
    %46 = arith.andi %43, %45 : vector<10x10xi1>
    %47 = arith.andi %41, %46 : vector<10x10xi1>
    %c5_i32_15 = arith.constant 5 : i32
    %48 = vector.broadcast %c5_i32_15 : i32 to vector<10x10xi32>
    %49 = arith.cmpi sge, %35, %48 : vector<10x10xi32>
    %c10_i32 = arith.constant 10 : i32
    %50 = vector.broadcast %c10_i32 : i32 to vector<10x10xi32>
    %51 = arith.cmpi slt, %35, %50 : vector<10x10xi32>
    %52 = arith.andi %49, %51 : vector<10x10xi1>
    %c5_i32_16 = arith.constant 5 : i32
    %53 = vector.broadcast %c5_i32_16 : i32 to vector<10x10xi32>
    %54 = arith.cmpi sge, %36, %53 : vector<10x10xi32>
    %c10_i32_17 = arith.constant 10 : i32
    %55 = vector.broadcast %c10_i32_17 : i32 to vector<10x10xi32>
    %56 = arith.cmpi slt, %36, %55 : vector<10x10xi32>
    %57 = arith.andi %54, %56 : vector<10x10xi1>
    %58 = arith.andi %52, %57 : vector<10x10xi1>
    %59 = arith.ori %47, %58 : vector<10x10xi1>
    %cst_18 = arith.constant 0.000000e+00 : f32
    %cst_19 = arith.constant -1.000000e+30 : f32
    %60 = vector.broadcast %cst_18 : f32 to vector<10x10xf32>
    %61 = vector.broadcast %cst_19 : f32 to vector<10x10xf32>
    %62 = arith.select %59, %60, %61 : vector<10x10xi1>, vector<10x10xf32>
    %c4 = arith.constant 4 : index
    %c0_20 = arith.constant 0 : index
    %63 = vector.load %arg4[%c4, %c0_20] : memref<16x32xf32, #tpu.memory_space<vmem>>, vector<1x32xf32>
    %c5 = arith.constant 5 : index
    %c0_21 = arith.constant 0 : index
    %64 = vector.load %arg4[%c5, %c0_21] : memref<16x32xf32, #tpu.memory_space<vmem>>, vector<1x32xf32>
    %cst_22 = arith.constant dense<0.000000e+00> : vector<10xf32>
    %65 = vector.multi_reduction <add>, %34, %cst_22 [1] : vector<10x32xf32> to vector<10xf32>
    %66 = vector.shape_cast %65 : vector<10xf32> to vector<10x1xf32>
    %cst_23 = arith.constant 3.200000e+01 : f32
    %67 = vector.broadcast %cst_23 : f32 to vector<10x1xf32>
    %68 = arith.divf %66, %67 : vector<10x1xf32>
    %69 = vector.broadcast %68 : vector<10x1xf32> to vector<10x32xf32>
    %70 = arith.subf %34, %69 : vector<10x32xf32>
    %71 = arith.mulf %70, %70 : vector<10x32xf32>
    %cst_24 = arith.constant dense<0.000000e+00> : vector<10xf32>
    %72 = vector.multi_reduction <add>, %71, %cst_24 [1] : vector<10x32xf32> to vector<10xf32>
    %73 = vector.shape_cast %72 : vector<10xf32> to vector<10x1xf32>
    %cst_25 = arith.constant 3.200000e+01 : f32
    %74 = vector.broadcast %cst_25 : f32 to vector<10x1xf32>
    %75 = arith.divf %73, %74 : vector<10x1xf32>
    %cst_26 = arith.constant 9.99999974E-6 : f32
    %76 = vector.broadcast %cst_26 : f32 to vector<10x1xf32>
    %77 = arith.addf %75, %76 : vector<10x1xf32>
    %78 = math.rsqrt %77 : vector<10x1xf32>
    %79 = vector.broadcast %78 : vector<10x1xf32> to vector<10x32xf32>
    %80 = arith.mulf %70, %79 : vector<10x32xf32>
    %81 = vector.broadcast %63 : vector<1x32xf32> to vector<10x32xf32>
    %82 = arith.mulf %80, %81 : vector<10x32xf32>
    %83 = vector.broadcast %64 : vector<1x32xf32> to vector<10x32xf32>
    %84 = arith.addf %82, %83 : vector<10x32xf32>
    %c0_27 = arith.constant 0 : index
    %c0_28 = arith.constant 0 : index
    %c0_29 = arith.constant 0 : index
    %85 = vector.load %arg5[%c0_27, %c0_28, %c0_29] : memref<2x32x96xf32, #tpu.memory_space<vmem>>, vector<1x32x96xf32>
    %86 = vector.shape_cast %85 : vector<1x32x96xf32> to vector<32x96xf32>
    %cst_30 = arith.constant dense<0.000000e+00> : vector<10x96xf32>
    %87 = tpu.matmul %84, %86, %cst_30 {dimension_numbers = #tpu.dot_dimension_numbers<[1], [0], [0], [1], [0, 0, 1, 1], [], []>} : vector<10x32xf32>, vector<32x96xf32>, vector<10x96xf32> -> vector<10x96xf32>
    %c0_31 = arith.constant 0 : index
    %c0_32 = arith.constant 0 : index
    %c0_33 = arith.constant 0 : index
    %88 = vector.load %arg6[%c0_31, %c0_32, %c0_33] : memref<2x1x96xf32, #tpu.memory_space<vmem>>, vector<1x1x96xf32>
    %89 = vector.shape_cast %88 : vector<1x1x96xf32> to vector<1x96xf32>
    %90 = vector.broadcast %89 : vector<1x96xf32> to vector<10x96xf32>
    %91 = arith.addf %87, %90 : vector<10x96xf32>
    %92 = vector.extract_strided_slice %91 {offsets = [0, 0], sizes = [10, 16], strides = [1, 1]} : vector<10x96xf32> to vector<10x16xf32>
    %93 = vector.extract_strided_slice %91 {offsets = [0, 32], sizes = [10, 16], strides = [1, 1]} : vector<10x96xf32> to vector<10x16xf32>
    %94 = vector.extract_strided_slice %91 {offsets = [0, 64], sizes = [10, 16], strides = [1, 1]} : vector<10x96xf32> to vector<10x16xf32>
    %cst_34 = arith.constant dense<0.000000e+00> : vector<10x10xf32>
    %95 = tpu.matmul %92, %93, %cst_34 {dimension_numbers = #tpu.dot_dimension_numbers<[1], [1], [0], [0], [0, 0, 1, 0], [], []>} : vector<10x16xf32>, vector<10x16xf32>, vector<10x10xf32> -> vector<10x10xf32>
    %96 = arith.addf %95, %62 : vector<10x10xf32>
    %cst_35 = arith.constant dense<0xFF800000> : vector<10xf32>
    %97 = vector.multi_reduction <maximumf>, %96, %cst_35 [1] : vector<10x10xf32> to vector<10xf32>
    %98 = vector.shape_cast %97 : vector<10xf32> to vector<10x1xf32>
    %99 = vector.broadcast %98 : vector<10x1xf32> to vector<10x10xf32>
    %100 = arith.subf %96, %99 : vector<10x10xf32>
    %101 = math.exp %100 : vector<10x10xf32>
    %cst_36 = arith.constant dense<0.000000e+00> : vector<10xf32>
    %102 = vector.multi_reduction <add>, %101, %cst_36 [1] : vector<10x10xf32> to vector<10xf32>
    %103 = vector.shape_cast %102 : vector<10xf32> to vector<10x1xf32>
    %104 = vector.broadcast %103 : vector<10x1xf32> to vector<10x10xf32>
    %105 = arith.divf %101, %104 : vector<10x10xf32>
    %cst_37 = arith.constant dense<0.000000e+00> : vector<10x16xf32>
    %106 = tpu.matmul %105, %94, %cst_37 {dimension_numbers = #tpu.dot_dimension_numbers<[1], [0], [0], [1], [0, 0, 1, 1], [], []>} : vector<10x10xf32>, vector<10x16xf32>, vector<10x16xf32> -> vector<10x16xf32>
    %107 = vector.extract_strided_slice %91 {offsets = [0, 16], sizes = [10, 16], strides = [1, 1]} : vector<10x96xf32> to vector<10x16xf32>
    %108 = vector.extract_strided_slice %91 {offsets = [0, 48], sizes = [10, 16], strides = [1, 1]} : vector<10x96xf32> to vector<10x16xf32>
    %109 = vector.extract_strided_slice %91 {offsets = [0, 80], sizes = [10, 16], strides = [1, 1]} : vector<10x96xf32> to vector<10x16xf32>
    %cst_38 = arith.constant dense<0.000000e+00> : vector<10x10xf32>
    %110 = tpu.matmul %107, %108, %cst_38 {dimension_numbers = #tpu.dot_dimension_numbers<[1], [1], [0], [0], [0, 0, 1, 0], [], []>} : vector<10x16xf32>, vector<10x16xf32>, vector<10x10xf32> -> vector<10x10xf32>
    %111 = arith.addf %110, %62 : vector<10x10xf32>
    %cst_39 = arith.constant dense<0xFF800000> : vector<10xf32>
    %112 = vector.multi_reduction <maximumf>, %111, %cst_39 [1] : vector<10x10xf32> to vector<10xf32>
    %113 = vector.shape_cast %112 : vector<10xf32> to vector<10x1xf32>
    %114 = vector.broadcast %113 : vector<10x1xf32> to vector<10x10xf32>
    %115 = arith.subf %111, %114 : vector<10x10xf32>
    %116 = math.exp %115 : vector<10x10xf32>
    %cst_40 = arith.constant dense<0.000000e+00> : vector<10xf32>
    %117 = vector.multi_reduction <add>, %116, %cst_40 [1] : vector<10x10xf32> to vector<10xf32>
    %118 = vector.shape_cast %117 : vector<10xf32> to vector<10x1xf32>
    %119 = vector.broadcast %118 : vector<10x1xf32> to vector<10x10xf32>
    %120 = arith.divf %116, %119 : vector<10x10xf32>
    %cst_41 = arith.constant dense<0.000000e+00> : vector<10x16xf32>
    %121 = tpu.matmul %120, %109, %cst_41 {dimension_numbers = #tpu.dot_dimension_numbers<[1], [0], [0], [1], [0, 0, 1, 1], [], []>} : vector<10x10xf32>, vector<10x16xf32>, vector<10x16xf32> -> vector<10x16xf32>
    %122 = tpu.concatenate %106, %121 in 1 : vector<10x16xf32>, vector<10x16xf32> -> vector<10x32xf32>
    %c0_42 = arith.constant 0 : index
    %c0_43 = arith.constant 0 : index
    %c0_44 = arith.constant 0 : index
    %123 = vector.load %arg7[%c0_42, %c0_43, %c0_44] : memref<2x32x32xf32, #tpu.memory_space<vmem>>, vector<1x32x32xf32>
    %124 = vector.shape_cast %123 : vector<1x32x32xf32> to vector<32x32xf32>
    %cst_45 = arith.constant dense<0.000000e+00> : vector<10x32xf32>
    %125 = tpu.matmul %122, %124, %cst_45 {dimension_numbers = #tpu.dot_dimension_numbers<[1], [0], [0], [1], [0, 0, 1, 1], [], []>} : vector<10x32xf32>, vector<32x32xf32>, vector<10x32xf32> -> vector<10x32xf32>
    %126 = arith.addf %34, %125 : vector<10x32xf32>
    %c6 = arith.constant 6 : index
    %c0_46 = arith.constant 0 : index
    %127 = vector.load %arg4[%c6, %c0_46] : memref<16x32xf32, #tpu.memory_space<vmem>>, vector<1x32xf32>
    %128 = vector.broadcast %127 : vector<1x32xf32> to vector<10x32xf32>
    %129 = arith.addf %126, %128 : vector<10x32xf32>
    %c7 = arith.constant 7 : index
    %c0_47 = arith.constant 0 : index
    %130 = vector.load %arg4[%c7, %c0_47] : memref<16x32xf32, #tpu.memory_space<vmem>>, vector<1x32xf32>
    %c8 = arith.constant 8 : index
    %c0_48 = arith.constant 0 : index
    %131 = vector.load %arg4[%c8, %c0_48] : memref<16x32xf32, #tpu.memory_space<vmem>>, vector<1x32xf32>
    %cst_49 = arith.constant dense<0.000000e+00> : vector<10xf32>
    %132 = vector.multi_reduction <add>, %129, %cst_49 [1] : vector<10x32xf32> to vector<10xf32>
    %133 = vector.shape_cast %132 : vector<10xf32> to vector<10x1xf32>
    %cst_50 = arith.constant 3.200000e+01 : f32
    %134 = vector.broadcast %cst_50 : f32 to vector<10x1xf32>
    %135 = arith.divf %133, %134 : vector<10x1xf32>
    %136 = vector.broadcast %135 : vector<10x1xf32> to vector<10x32xf32>
    %137 = arith.subf %129, %136 : vector<10x32xf32>
    %138 = arith.mulf %137, %137 : vector<10x32xf32>
    %cst_51 = arith.constant dense<0.000000e+00> : vector<10xf32>
    %139 = vector.multi_reduction <add>, %138, %cst_51 [1] : vector<10x32xf32> to vector<10xf32>
    %140 = vector.shape_cast %139 : vector<10xf32> to vector<10x1xf32>
    %cst_52 = arith.constant 3.200000e+01 : f32
    %141 = vector.broadcast %cst_52 : f32 to vector<10x1xf32>
    %142 = arith.divf %140, %141 : vector<10x1xf32>
    %cst_53 = arith.constant 9.99999974E-6 : f32
    %143 = vector.broadcast %cst_53 : f32 to vector<10x1xf32>
    %144 = arith.addf %142, %143 : vector<10x1xf32>
    %145 = math.rsqrt %144 : vector<10x1xf32>
    %146 = vector.broadcast %145 : vector<10x1xf32> to vector<10x32xf32>
    %147 = arith.mulf %137, %146 : vector<10x32xf32>
    %148 = vector.broadcast %130 : vector<1x32xf32> to vector<10x32xf32>
    %149 = arith.mulf %147, %148 : vector<10x32xf32>
    %150 = vector.broadcast %131 : vector<1x32xf32> to vector<10x32xf32>
    %151 = arith.addf %149, %150 : vector<10x32xf32>
    %c0_54 = arith.constant 0 : index
    %c0_55 = arith.constant 0 : index
    %c0_56 = arith.constant 0 : index
    %152 = vector.load %arg8[%c0_54, %c0_55, %c0_56] : memref<2x32x64xf32, #tpu.memory_space<vmem>>, vector<1x32x64xf32>
    %153 = vector.shape_cast %152 : vector<1x32x64xf32> to vector<32x64xf32>
    %cst_57 = arith.constant dense<0.000000e+00> : vector<10x64xf32>
    %154 = tpu.matmul %151, %153, %cst_57 {dimension_numbers = #tpu.dot_dimension_numbers<[1], [0], [0], [1], [0, 0, 1, 1], [], []>} : vector<10x32xf32>, vector<32x64xf32>, vector<10x64xf32> -> vector<10x64xf32>
    %c0_58 = arith.constant 0 : index
    %c0_59 = arith.constant 0 : index
    %c0_60 = arith.constant 0 : index
    %155 = vector.load %arg9[%c0_58, %c0_59, %c0_60] : memref<2x1x64xf32, #tpu.memory_space<vmem>>, vector<1x1x64xf32>
    %156 = vector.shape_cast %155 : vector<1x1x64xf32> to vector<1x64xf32>
    %157 = vector.broadcast %156 : vector<1x64xf32> to vector<10x64xf32>
    %158 = arith.addf %154, %157 : vector<10x64xf32>
    %cst_61 = arith.constant 1.702000e+00 : f32
    %159 = vector.broadcast %cst_61 : f32 to vector<10x64xf32>
    %160 = arith.mulf %159, %158 : vector<10x64xf32>
    %161 = arith.negf %160 : vector<10x64xf32>
    %162 = math.exp %161 : vector<10x64xf32>
    %cst_62 = arith.constant 1.000000e+00 : f32
    %163 = vector.broadcast %cst_62 : f32 to vector<10x64xf32>
    %164 = arith.addf %163, %162 : vector<10x64xf32>
    %165 = arith.divf %163, %164 : vector<10x64xf32>
    %166 = arith.mulf %158, %165 : vector<10x64xf32>
    %c0_63 = arith.constant 0 : index
    %c0_64 = arith.constant 0 : index
    %c0_65 = arith.constant 0 : index
    %167 = vector.load %arg10[%c0_63, %c0_64, %c0_65] : memref<2x64x32xf32, #tpu.memory_space<vmem>>, vector<1x64x32xf32>
    %168 = vector.shape_cast %167 : vector<1x64x32xf32> to vector<64x32xf32>
    %cst_66 = arith.constant dense<0.000000e+00> : vector<10x32xf32>
    %169 = tpu.matmul %166, %168, %cst_66 {dimension_numbers = #tpu.dot_dimension_numbers<[1], [0], [0], [1], [0, 0, 1, 1], [], []>} : vector<10x64xf32>, vector<64x32xf32>, vector<10x32xf32> -> vector<10x32xf32>
    %170 = arith.addf %129, %169 : vector<10x32xf32>
    %c9 = arith.constant 9 : index
    %c0_67 = arith.constant 0 : index
    %171 = vector.load %arg4[%c9, %c0_67] : memref<16x32xf32, #tpu.memory_space<vmem>>, vector<1x32xf32>
    %172 = vector.broadcast %171 : vector<1x32xf32> to vector<10x32xf32>
    %173 = arith.addf %170, %172 : vector<10x32xf32>
    %c10 = arith.constant 10 : index
    %c0_68 = arith.constant 0 : index
    %174 = vector.load %arg4[%c10, %c0_68] : memref<16x32xf32, #tpu.memory_space<vmem>>, vector<1x32xf32>
    %c11 = arith.constant 11 : index
    %c0_69 = arith.constant 0 : index
    %175 = vector.load %arg4[%c11, %c0_69] : memref<16x32xf32, #tpu.memory_space<vmem>>, vector<1x32xf32>
    %cst_70 = arith.constant dense<0.000000e+00> : vector<10xf32>
    %176 = vector.multi_reduction <add>, %173, %cst_70 [1] : vector<10x32xf32> to vector<10xf32>
    %177 = vector.shape_cast %176 : vector<10xf32> to vector<10x1xf32>
    %cst_71 = arith.constant 3.200000e+01 : f32
    %178 = vector.broadcast %cst_71 : f32 to vector<10x1xf32>
    %179 = arith.divf %177, %178 : vector<10x1xf32>
    %180 = vector.broadcast %179 : vector<10x1xf32> to vector<10x32xf32>
    %181 = arith.subf %173, %180 : vector<10x32xf32>
    %182 = arith.mulf %181, %181 : vector<10x32xf32>
    %cst_72 = arith.constant dense<0.000000e+00> : vector<10xf32>
    %183 = vector.multi_reduction <add>, %182, %cst_72 [1] : vector<10x32xf32> to vector<10xf32>
    %184 = vector.shape_cast %183 : vector<10xf32> to vector<10x1xf32>
    %cst_73 = arith.constant 3.200000e+01 : f32
    %185 = vector.broadcast %cst_73 : f32 to vector<10x1xf32>
    %186 = arith.divf %184, %185 : vector<10x1xf32>
    %cst_74 = arith.constant 9.99999974E-6 : f32
    %187 = vector.broadcast %cst_74 : f32 to vector<10x1xf32>
    %188 = arith.addf %186, %187 : vector<10x1xf32>
    %189 = math.rsqrt %188 : vector<10x1xf32>
    %190 = vector.broadcast %189 : vector<10x1xf32> to vector<10x32xf32>
    %191 = arith.mulf %181, %190 : vector<10x32xf32>
    %192 = vector.broadcast %174 : vector<1x32xf32> to vector<10x32xf32>
    %193 = arith.mulf %191, %192 : vector<10x32xf32>
    %194 = vector.broadcast %175 : vector<1x32xf32> to vector<10x32xf32>
    %195 = arith.addf %193, %194 : vector<10x32xf32>
    %c1_75 = arith.constant 1 : index
    %c0_76 = arith.constant 0 : index
    %c0_77 = arith.constant 0 : index
    %196 = vector.load %arg5[%c1_75, %c0_76, %c0_77] : memref<2x32x96xf32, #tpu.memory_space<vmem>>, vector<1x32x96xf32>
    %197 = vector.shape_cast %196 : vector<1x32x96xf32> to vector<32x96xf32>
    %cst_78 = arith.constant dense<0.000000e+00> : vector<10x96xf32>
    %198 = tpu.matmul %195, %197, %cst_78 {dimension_numbers = #tpu.dot_dimension_numbers<[1], [0], [0], [1], [0, 0, 1, 1], [], []>} : vector<10x32xf32>, vector<32x96xf32>, vector<10x96xf32> -> vector<10x96xf32>
    %c1_79 = arith.constant 1 : index
    %c0_80 = arith.constant 0 : index
    %c0_81 = arith.constant 0 : index
    %199 = vector.load %arg6[%c1_79, %c0_80, %c0_81] : memref<2x1x96xf32, #tpu.memory_space<vmem>>, vector<1x1x96xf32>
    %200 = vector.shape_cast %199 : vector<1x1x96xf32> to vector<1x96xf32>
    %201 = vector.broadcast %200 : vector<1x96xf32> to vector<10x96xf32>
    %202 = arith.addf %198, %201 : vector<10x96xf32>
    %203 = vector.extract_strided_slice %202 {offsets = [0, 0], sizes = [10, 16], strides = [1, 1]} : vector<10x96xf32> to vector<10x16xf32>
    %204 = vector.extract_strided_slice %202 {offsets = [0, 32], sizes = [10, 16], strides = [1, 1]} : vector<10x96xf32> to vector<10x16xf32>
    %205 = vector.extract_strided_slice %202 {offsets = [0, 64], sizes = [10, 16], strides = [1, 1]} : vector<10x96xf32> to vector<10x16xf32>
    %cst_82 = arith.constant dense<0.000000e+00> : vector<10x10xf32>
    %206 = tpu.matmul %203, %204, %cst_82 {dimension_numbers = #tpu.dot_dimension_numbers<[1], [1], [0], [0], [0, 0, 1, 0], [], []>} : vector<10x16xf32>, vector<10x16xf32>, vector<10x10xf32> -> vector<10x10xf32>
    %207 = arith.addf %206, %62 : vector<10x10xf32>
    %cst_83 = arith.constant dense<0xFF800000> : vector<10xf32>
    %208 = vector.multi_reduction <maximumf>, %207, %cst_83 [1] : vector<10x10xf32> to vector<10xf32>
    %209 = vector.shape_cast %208 : vector<10xf32> to vector<10x1xf32>
    %210 = vector.broadcast %209 : vector<10x1xf32> to vector<10x10xf32>
    %211 = arith.subf %207, %210 : vector<10x10xf32>
    %212 = math.exp %211 : vector<10x10xf32>
    %cst_84 = arith.constant dense<0.000000e+00> : vector<10xf32>
    %213 = vector.multi_reduction <add>, %212, %cst_84 [1] : vector<10x10xf32> to vector<10xf32>
    %214 = vector.shape_cast %213 : vector<10xf32> to vector<10x1xf32>
    %215 = vector.broadcast %214 : vector<10x1xf32> to vector<10x10xf32>
    %216 = arith.divf %212, %215 : vector<10x10xf32>
    %cst_85 = arith.constant dense<0.000000e+00> : vector<10x16xf32>
    %217 = tpu.matmul %216, %205, %cst_85 {dimension_numbers = #tpu.dot_dimension_numbers<[1], [0], [0], [1], [0, 0, 1, 1], [], []>} : vector<10x10xf32>, vector<10x16xf32>, vector<10x16xf32> -> vector<10x16xf32>
    %218 = vector.extract_strided_slice %202 {offsets = [0, 16], sizes = [10, 16], strides = [1, 1]} : vector<10x96xf32> to vector<10x16xf32>
    %219 = vector.extract_strided_slice %202 {offsets = [0, 48], sizes = [10, 16], strides = [1, 1]} : vector<10x96xf32> to vector<10x16xf32>
    %220 = vector.extract_strided_slice %202 {offsets = [0, 80], sizes = [10, 16], strides = [1, 1]} : vector<10x96xf32> to vector<10x16xf32>
    %cst_86 = arith.constant dense<0.000000e+00> : vector<10x10xf32>
    %221 = tpu.matmul %218, %219, %cst_86 {dimension_numbers = #tpu.dot_dimension_numbers<[1], [1], [0], [0], [0, 0, 1, 0], [], []>} : vector<10x16xf32>, vector<10x16xf32>, vector<10x10xf32> -> vector<10x10xf32>
    %222 = arith.addf %221, %62 : vector<10x10xf32>
    %cst_87 = arith.constant dense<0xFF800000> : vector<10xf32>
    %223 = vector.multi_reduction <maximumf>, %222, %cst_87 [1] : vector<10x10xf32> to vector<10xf32>
    %224 = vector.shape_cast %223 : vector<10xf32> to vector<10x1xf32>
    %225 = vector.broadcast %224 : vector<10x1xf32> to vector<10x10xf32>
    %226 = arith.subf %222, %225 : vector<10x10xf32>
    %227 = math.exp %226 : vector<10x10xf32>
    %cst_88 = arith.constant dense<0.000000e+00> : vector<10xf32>
    %228 = vector.multi_reduction <add>, %227, %cst_88 [1] : vector<10x10xf32> to vector<10xf32>
    %229 = vector.shape_cast %228 : vector<10xf32> to vector<10x1xf32>
    %230 = vector.broadcast %229 : vector<10x1xf32> to vector<10x10xf32>
    %231 = arith.divf %227, %230 : vector<10x10xf32>
    %cst_89 = arith.constant dense<0.000000e+00> : vector<10x16xf32>
    %232 = tpu.matmul %231, %220, %cst_89 {dimension_numbers = #tpu.dot_dimension_numbers<[1], [0], [0], [1], [0, 0, 1, 1], [], []>} : vector<10x10xf32>, vector<10x16xf32>, vector<10x16xf32> -> vector<10x16xf32>
    %233 = tpu.concatenate %217, %232 in 1 : vector<10x16xf32>, vector<10x16xf32> -> vector<10x32xf32>
    %c1_90 = arith.constant 1 : index
    %c0_91 = arith.constant 0 : index
    %c0_92 = arith.constant 0 : index
    %234 = vector.load %arg7[%c1_90, %c0_91, %c0_92] : memref<2x32x32xf32, #tpu.memory_space<vmem>>, vector<1x32x32xf32>
    %235 = vector.shape_cast %234 : vector<1x32x32xf32> to vector<32x32xf32>
    %cst_93 = arith.constant dense<0.000000e+00> : vector<10x32xf32>
    %236 = tpu.matmul %233, %235, %cst_93 {dimension_numbers = #tpu.dot_dimension_numbers<[1], [0], [0], [1], [0, 0, 1, 1], [], []>} : vector<10x32xf32>, vector<32x32xf32>, vector<10x32xf32> -> vector<10x32xf32>
    %237 = arith.addf %173, %236 : vector<10x32xf32>
    %c12 = arith.constant 12 : index
    %c0_94 = arith.constant 0 : index
    %238 = vector.load %arg4[%c12, %c0_94] : memref<16x32xf32, #tpu.memory_space<vmem>>, vector<1x32xf32>
    %239 = vector.broadcast %238 : vector<1x32xf32> to vector<10x32xf32>
    %240 = arith.addf %237, %239 : vector<10x32xf32>
    %c13 = arith.constant 13 : index
    %c0_95 = arith.constant 0 : index
    %241 = vector.load %arg4[%c13, %c0_95] : memref<16x32xf32, #tpu.memory_space<vmem>>, vector<1x32xf32>
    %c14 = arith.constant 14 : index
    %c0_96 = arith.constant 0 : index
    %242 = vector.load %arg4[%c14, %c0_96] : memref<16x32xf32, #tpu.memory_space<vmem>>, vector<1x32xf32>
    %cst_97 = arith.constant dense<0.000000e+00> : vector<10xf32>
    %243 = vector.multi_reduction <add>, %240, %cst_97 [1] : vector<10x32xf32> to vector<10xf32>
    %244 = vector.shape_cast %243 : vector<10xf32> to vector<10x1xf32>
    %cst_98 = arith.constant 3.200000e+01 : f32
    %245 = vector.broadcast %cst_98 : f32 to vector<10x1xf32>
    %246 = arith.divf %244, %245 : vector<10x1xf32>
    %247 = vector.broadcast %246 : vector<10x1xf32> to vector<10x32xf32>
    %248 = arith.subf %240, %247 : vector<10x32xf32>
    %249 = arith.mulf %248, %248 : vector<10x32xf32>
    %cst_99 = arith.constant dense<0.000000e+00> : vector<10xf32>
    %250 = vector.multi_reduction <add>, %249, %cst_99 [1] : vector<10x32xf32> to vector<10xf32>
    %251 = vector.shape_cast %250 : vector<10xf32> to vector<10x1xf32>
    %cst_100 = arith.constant 3.200000e+01 : f32
    %252 = vector.broadcast %cst_100 : f32 to vector<10x1xf32>
    %253 = arith.divf %251, %252 : vector<10x1xf32>
    %cst_101 = arith.constant 9.99999974E-6 : f32
    %254 = vector.broadcast %cst_101 : f32 to vector<10x1xf32>
    %255 = arith.addf %253, %254 : vector<10x1xf32>
    %256 = math.rsqrt %255 : vector<10x1xf32>
    %257 = vector.broadcast %256 : vector<10x1xf32> to vector<10x32xf32>
    %258 = arith.mulf %248, %257 : vector<10x32xf32>
    %259 = vector.broadcast %241 : vector<1x32xf32> to vector<10x32xf32>
    %260 = arith.mulf %258, %259 : vector<10x32xf32>
    %261 = vector.broadcast %242 : vector<1x32xf32> to vector<10x32xf32>
    %262 = arith.addf %260, %261 : vector<10x32xf32>
    %c1_102 = arith.constant 1 : index
    %c0_103 = arith.constant 0 : index
    %c0_104 = arith.constant 0 : index
    %263 = vector.load %arg8[%c1_102, %c0_103, %c0_104] : memref<2x32x64xf32, #tpu.memory_space<vmem>>, vector<1x32x64xf32>
    %264 = vector.shape_cast %263 : vector<1x32x64xf32> to vector<32x64xf32>
    %cst_105 = arith.constant dense<0.000000e+00> : vector<10x64xf32>
    %265 = tpu.matmul %262, %264, %cst_105 {dimension_numbers = #tpu.dot_dimension_numbers<[1], [0], [0], [1], [0, 0, 1, 1], [], []>} : vector<10x32xf32>, vector<32x64xf32>, vector<10x64xf32> -> vector<10x64xf32>
    %c1_106 = arith.constant 1 : index
    %c0_107 = arith.constant 0 : index
    %c0_108 = arith.constant 0 : index
    %266 = vector.load %arg9[%c1_106, %c0_107, %c0_108] : memref<2x1x64xf32, #tpu.memory_space<vmem>>, vector<1x1x64xf32>
    %267 = vector.shape_cast %266 : vector<1x1x64xf32> to vector<1x64xf32>
    %268 = vector.broadcast %267 : vector<1x64xf32> to vector<10x64xf32>
    %269 = arith.addf %265, %268 : vector<10x64xf32>
    %cst_109 = arith.constant 1.702000e+00 : f32
    %270 = vector.broadcast %cst_109 : f32 to vector<10x64xf32>
    %271 = arith.mulf %270, %269 : vector<10x64xf32>
    %272 = arith.negf %271 : vector<10x64xf32>
    %273 = math.exp %272 : vector<10x64xf32>
    %cst_110 = arith.constant 1.000000e+00 : f32
    %274 = vector.broadcast %cst_110 : f32 to vector<10x64xf32>
    %275 = arith.addf %274, %273 : vector<10x64xf32>
    %276 = arith.divf %274, %275 : vector<10x64xf32>
    %277 = arith.mulf %269, %276 : vector<10x64xf32>
    %c1_111 = arith.constant 1 : index
    %c0_112 = arith.constant 0 : index
    %c0_113 = arith.constant 0 : index
    %278 = vector.load %arg10[%c1_111, %c0_112, %c0_113] : memref<2x64x32xf32, #tpu.memory_space<vmem>>, vector<1x64x32xf32>
    %279 = vector.shape_cast %278 : vector<1x64x32xf32> to vector<64x32xf32>
    %cst_114 = arith.constant dense<0.000000e+00> : vector<10x32xf32>
    %280 = tpu.matmul %277, %279, %cst_114 {dimension_numbers = #tpu.dot_dimension_numbers<[1], [0], [0], [1], [0, 0, 1, 1], [], []>} : vector<10x64xf32>, vector<64x32xf32>, vector<10x32xf32> -> vector<10x32xf32>
    %281 = arith.addf %240, %280 : vector<10x32xf32>
    %c15 = arith.constant 15 : index
    %c0_115 = arith.constant 0 : index
    %282 = vector.load %arg4[%c15, %c0_115] : memref<16x32xf32, #tpu.memory_space<vmem>>, vector<1x32xf32>
    %283 = vector.broadcast %282 : vector<1x32xf32> to vector<10x32xf32>
    %284 = arith.addf %281, %283 : vector<10x32xf32>
    %285 = vector.extract_strided_slice %284 {offsets = [0, 0], sizes = [1, 32], strides = [1, 1]} : vector<10x32xf32> to vector<1x32xf32>
    %286 = vector.extract_strided_slice %284 {offsets = [5, 0], sizes = [1, 32], strides = [1, 1]} : vector<10x32xf32> to vector<1x32xf32>
    %287 = tpu.concatenate %285, %286 in 0 : vector<1x32xf32>, vector<1x32xf32> -> vector<2x32xf32>
    %c2 = arith.constant 2 : index
    %c0_116 = arith.constant 0 : index
    %288 = vector.load %arg4[%c2, %c0_116] : memref<16x32xf32, #tpu.memory_space<vmem>>, vector<1x32xf32>
    %c3 = arith.constant 3 : index
    %c0_117 = arith.constant 0 : index
    %289 = vector.load %arg4[%c3, %c0_117] : memref<16x32xf32, #tpu.memory_space<vmem>>, vector<1x32xf32>
    %cst_118 = arith.constant dense<0.000000e+00> : vector<2xf32>
    %290 = vector.multi_reduction <add>, %287, %cst_118 [1] : vector<2x32xf32> to vector<2xf32>
    %291 = vector.shape_cast %290 : vector<2xf32> to vector<2x1xf32>
    %cst_119 = arith.constant 3.200000e+01 : f32
    %292 = vector.broadcast %cst_119 : f32 to vector<2x1xf32>
    %293 = arith.divf %291, %292 : vector<2x1xf32>
    %294 = vector.broadcast %293 : vector<2x1xf32> to vector<2x32xf32>
    %295 = arith.subf %287, %294 : vector<2x32xf32>
    %296 = arith.mulf %295, %295 : vector<2x32xf32>
    %cst_120 = arith.constant dense<0.000000e+00> : vector<2xf32>
    %297 = vector.multi_reduction <add>, %296, %cst_120 [1] : vector<2x32xf32> to vector<2xf32>
    %298 = vector.shape_cast %297 : vector<2xf32> to vector<2x1xf32>
    %cst_121 = arith.constant 3.200000e+01 : f32
    %299 = vector.broadcast %cst_121 : f32 to vector<2x1xf32>
    %300 = arith.divf %298, %299 : vector<2x1xf32>
    %cst_122 = arith.constant 9.99999974E-6 : f32
    %301 = vector.broadcast %cst_122 : f32 to vector<2x1xf32>
    %302 = arith.addf %300, %301 : vector<2x1xf32>
    %303 = math.rsqrt %302 : vector<2x1xf32>
    %304 = vector.broadcast %303 : vector<2x1xf32> to vector<2x32xf32>
    %305 = arith.mulf %295, %304 : vector<2x32xf32>
    %306 = vector.broadcast %288 : vector<1x32xf32> to vector<2x32xf32>
    %307 = arith.mulf %305, %306 : vector<2x32xf32>
    %308 = vector.broadcast %289 : vector<1x32xf32> to vector<2x32xf32>
    %309 = arith.addf %307, %308 : vector<2x32xf32>
    %c0_123 = arith.constant 0 : index
    %c0_124 = arith.constant 0 : index
    %310 = vector.load %arg11[%c0_123, %c0_124] : memref<32x16xf32, #tpu.memory_space<vmem>>, vector<32x16xf32>
    %cst_125 = arith.constant dense<0.000000e+00> : vector<2x16xf32>
    %311 = tpu.matmul %309, %310, %cst_125 {dimension_numbers = #tpu.dot_dimension_numbers<[1], [0], [0], [1], [0, 0, 1, 1], [], []>} : vector<2x32xf32>, vector<32x16xf32>, vector<2x16xf32> -> vector<2x16xf32>
    %312 = arith.mulf %311, %311 : vector<2x16xf32>
    %cst_126 = arith.constant dense<0.000000e+00> : vector<2xf32>
    %313 = vector.multi_reduction <add>, %312, %cst_126 [1] : vector<2x16xf32> to vector<2xf32>
    %314 = vector.shape_cast %313 : vector<2xf32> to vector<2x1xf32>
    %cst_127 = arith.constant 9.99999996E-13 : f32
    %315 = vector.broadcast %cst_127 : f32 to vector<2x1xf32>
    %316 = arith.addf %314, %315 : vector<2x1xf32>
    %317 = math.rsqrt %316 : vector<2x1xf32>
    %318 = vector.broadcast %317 : vector<2x1xf32> to vector<2x16xf32>
    %319 = arith.mulf %311, %318 : vector<2x16xf32>
    %c0_128 = arith.constant 0 : index
    %c0_129 = arith.constant 0 : index
    %320 = vector.load %arg12[%c0_128, %c0_129] : memref<2x16xf32, #tpu.memory_space<vmem>>, vector<2x16xf32>
    tpu.vector_store %arg12[%c0_128, %c0_129], %319 {strides = array<i32>} : memref<2x16xf32, #tpu.memory_space<vmem>>, vector<2x16xf32>,
    return
  }
  func.func @transform_0(%arg0: i32) -> (i32, i32) {
    %c0_i32 = arith.constant 0 : i32
    %c0_i32_0 = arith.constant 0 : i32
    %c0_i32_1 = arith.constant 0 : i32
    return %c0_i32, %c0_i32_0 : i32, i32
  }
  func.func @transform_1(%arg0: i32) -> (i32, i32) {
    %c0_i32 = arith.constant 0 : i32
    %c0_i32_0 = arith.constant 0 : i32
    %c0_i32_1 = arith.constant 0 : i32
    return %c0_i32, %c0_i32_0 : i32, i32
  }
  func.func @transform_2(%arg0: i32) -> (i32, i32) {
    %c0_i32 = arith.constant 0 : i32
    %c0_i32_0 = arith.constant 0 : i32
    %c0_i32_1 = arith.constant 0 : i32
    return %c0_i32, %c0_i32_0 : i32, i32
  }
  func.func @transform_3(%arg0: i32) -> (i32, i32) {
    %c0_i32 = arith.constant 0 : i32
    %c0_i32_0 = arith.constant 0 : i32
    %c0_i32_1 = arith.constant 0 : i32
    return %c0_i32, %c0_i32_0 : i32, i32
  }
  func.func @transform_4(%arg0: i32) -> (i32, i32, i32) {
    %c0_i32 = arith.constant 0 : i32
    %c0_i32_0 = arith.constant 0 : i32
    %c0_i32_1 = arith.constant 0 : i32
    %c0_i32_2 = arith.constant 0 : i32
    return %c0_i32, %c0_i32_0, %c0_i32_1 : i32, i32, i32
  }
  func.func @transform_5(%arg0: i32) -> (i32, i32, i32) {
    %c0_i32 = arith.constant 0 : i32
    %c0_i32_0 = arith.constant 0 : i32
    %c0_i32_1 = arith.constant 0 : i32
    %c0_i32_2 = arith.constant 0 : i32
    return %c0_i32, %c0_i32_0, %c0_i32_1 : i32, i32, i32
  }
  func.func @transform_6(%arg0: i32) -> (i32, i32, i32) {
    %c0_i32 = arith.constant 0 : i32
    %c0_i32_0 = arith.constant 0 : i32
    %c0_i32_1 = arith.constant 0 : i32
    %c0_i32_2 = arith.constant 0 : i32
    return %c0_i32, %c0_i32_0, %c0_i32_1 : i32, i32, i32
  }
  func.func @transform_7(%arg0: i32) -> (i32, i32, i32) {
    %c0_i32 = arith.constant 0 : i32
    %c0_i32_0 = arith.constant 0 : i32
    %c0_i32_1 = arith.constant 0 : i32
    %c0_i32_2 = arith.constant 0 : i32
    return %c0_i32, %c0_i32_0, %c0_i32_1 : i32, i32, i32
  }
  func.func @transform_8(%arg0: i32) -> (i32, i32, i32) {
    %c0_i32 = arith.constant 0 : i32
    %c0_i32_0 = arith.constant 0 : i32
    %c0_i32_1 = arith.constant 0 : i32
    %c0_i32_2 = arith.constant 0 : i32
    return %c0_i32, %c0_i32_0, %c0_i32_1 : i32, i32, i32
  }
  func.func @transform_9(%arg0: i32) -> (i32, i32, i32) {
    %c0_i32 = arith.constant 0 : i32
    %c0_i32_0 = arith.constant 0 : i32
    %c0_i32_1 = arith.constant 0 : i32
    %c0_i32_2 = arith.constant 0 : i32
    return %c0_i32, %c0_i32_0, %c0_i32_1 : i32, i32, i32
  }
  func.func @transform_10(%arg0: i32) -> (i32, i32) {
    %c0_i32 = arith.constant 0 : i32
    %c0_i32_0 = arith.constant 0 : i32
    %c0_i32_1 = arith.constant 0 : i32
    return %c0_i32, %c0_i32_0 : i32, i32
  }
  func.func @transform_11(%arg0: i32) -> (i32, i32) {
    %c0_i32 = arith.constant 0 : i32
    %c0_i32_0 = arith.constant 0 : i32
    %c0_i32_1 = arith.constant 0 : i32
    return %c0_i32, %c0_i32_0 : i32, i32
  }
}

</mosaic_0001>

<bundles_post_ra>
// kernel: calc_img_embedding.1
= control target key start
LH: loop header
LB: loop body
LE: loop exit
PB: predicated region body
PF: predicated region fallthrough
CT: control target
= control target key end

     0   :  { %s2212_s0 = inlined_call_operand.vmem [shape: f32[8,192], index: 0, kind: input, shape index: {}]   ;;  %s2213_s1 = inlined_call_operand.vmem [shape: f32[192,32], index: 1, kind: input, shape index: {}]   ;;  %s2214_s2 = inlined_call_operand.vmem [shape: f32[5,32], index: 2, kind: input, shape index: {}]   ;;  %s2215_s3 = inlined_call_operand.vmem [shape: f32[16,32], index: 3, kind: input, shape index: {}]   ;;  %s2216_s4 = inlined_call_operand.vmem [shape: f32[2,32,96], index: 4, kind: input, shape index: {}]   ;;  %s2217_s5 = inlined_call_operand.vmem [shape: f32[2,1,96], index: 5, kind: input, shape index: {}]   ;;  %s2218_s6 = inlined_call_operand.vmem [shape: f32[2,32,32], index: 6, kind: input, shape index: {}]   ;;  %s2219_s7 = inlined_call_operand.vmem [shape: f32[2,32,64], index: 7, kind: input, shape index: {}]   ;;  %s2220_s8 = inlined_call_operand.vmem [shape: f32[2,1,64], index: 8, kind: input, shape index: {}]   ;;  %s2221_s9 = inlined_call_operand.vmem [shape: f32[2,64,32], index: 9, kind: input, shape index: {}]   ;;  %s2222_s10 = inlined_call_operand.vmem [shape: f32[32,16], index: 10, kind: input, shape index: {}]   ;;  %s2223_s11 = inlined_call_operand.hbm [shape: f32[2,16], index: 11, kind: output, shape index: {}]  }
   0x1   :  { %v56_v0 = vld [vmem:[%s2213_s1 + $0x78] sm:$0xff]  ;;  %v55_v1 = vld [vmem:[%s2213_s1 + $0x70] sm:$0xff]  ;;  %v54_v2 = vld [vmem:[%s2213_s1 + $0x68] sm:$0xff] }
   0x2   :  { %69 = vmatpush.msra.mxu0 %v56_v0  ;;  %v64_v3 = vld [vmem:[%s2213_s1 + $0xb8] sm:$0xff]  ;;  %v63_v4 = vld [vmem:[%s2213_s1 + $0xb0] sm:$0xff]  ;;  %v53_v5 = vld [vmem:[%s2213_s1 + $0x60] sm:$0xff] }
   0x3   :  { %97 = vmatpush.msra.mxu1 %v64_v3  ;;  %v62_v6 = vld [vmem:[%s2213_s1 + $0xa8] sm:$0xff]  ;;  %v52_v7 = vld [vmem:[%s2213_s1 + $0x58] sm:$0xff]  ;;  %v51_v8 = vld [vmem:[%s2213_s1 + $0x50] sm:$0xff] }
   0x4   :  { %70 = vmatpush.msra.mxu0 %v55_v1  ;;  %v61_v9 = vld [vmem:[%s2213_s1 + $0xa0] sm:$0xff]  ;;  %v50_v10 = vld [vmem:[%s2213_s1 + $0x48] sm:$0xff]  ;;  %v60_v11 = vld [vmem:[%s2213_s1 + $0x98] sm:$0xff] }
   0x5   :  { %98 = vmatpush.msra.mxu1 %v63_v4  ;;  %v59_v12 = vld [vmem:[%s2213_s1 + $0x90] sm:$0xff]  ;;  %v49_v13 = vld [vmem:[%s2213_s1 + $0x40] sm:$0xff]  ;;  %v58_v14 = vld [vmem:[%s2213_s1 + $0x88] sm:$0xff] }
   0x6   :  { %71 = vmatpush.msra.mxu0 %v54_v2  ;;  %v48_v15 = vld [vmem:[%s2213_s1 + $0x38] sm:$0xff]  ;;  %v57_v16 = vld [vmem:[%s2213_s1 + $0x80] sm:$0xff] }
   0x7   :  { %99 = vmatpush.msra.mxu1 %v62_v6 }
   0x8   :  { %72 = vmatpush.msra.mxu0 %v53_v5 }
   0x9   :  { %100 = vmatpush.msra.mxu1 %v61_v9 }
   0xa   :  { %73 = vmatpush.msra.mxu0 %v52_v7 }
   0xb   :  { %101 = vmatpush.msra.mxu1 %v60_v11 }
   0xc   :  { %74 = vmatpush.msra.mxu0 %v51_v8 }
   0xd   :  { %102 = vmatpush.msra.mxu1 %v59_v12 }
   0xe   :  { %75 = vmatpush.msra.mxu0 %v50_v10 }
  0x10   :  { %76 = vmatpush.msra.mxu0 %v49_v13 }
  0x11   :  { %16 = vsyncpa [#allocation3], 0  ;;  %v47_v17 = vld [vmem:[%s2213_s1 + $0x30] sm:$0xff]  ;;  %103 = vmatpush.msra.mxu1 %v58_v14  ;;  %v40_v18 = vld [vmem:[%s2212_s0 + $0x8] sm:$0xff]  ;;  %vm65_vm0 = vcmask 523264   ;;  %vm2224_vm1 = vcmask 1040384  }
  0x12   :  { %77 = vmatpush.msra.mxu0 %v48_v15  ;;  %v46_v19 = vld [vmem:[%s2213_s1 + $0x28] sm:$0xff]  ;;  %v45_v20 = vld [vmem:[%s2213_s1 + $0x20] sm:$0xff]  ;;  %v44_v21 = vld [vmem:[%s2213_s1 + $0x18] sm:$0xff]  ;;  %vm127_vm2 = vcmask 1044480   ;;  %vm129_vm3 = vcmask 1045504   ;;  %vm133_vm4 = vcmask 261120  }
  0x13   :  { %104 = vmatpush.msra.mxu1 %v57_v16  ;;  %v43_v22 = vld [vmem:[%s2213_s1 + $0x10] sm:$0xff]  ;;  %v42_v23 = vld [vmem:[%s2213_s1 + $0x8] sm:$0xff]  ;;  %v41_v24 = vld [vmem:[%s2213_s1] sm:$0xff]  ;;  %vm137_vm5 = vcmask 254976   ;;  %v1636_v42 = vmov 32.0   ;;  %s1637_s29 = smov 112  }
  0x14   :  { %78 = vmatpush.msra.mxu0 %v47_v17  ;;  %1435 = vmatmul.msk.f32.vlgmr.msra.gmra.mxu1 %vm65_vm0, %v40_v18  ;;  %v39_v25 = vld [vmem:[%s2212_s0] sm:$0xff]  ;;  %1536 = vrcp.f32 %v1636_v42  ;;  %s1638_s30 = smov 80   ;;  %s1639_s12 = smov 96  }
  0x15   :  { %v109_v26 = vld [vmem:[%s2214_s2] sm:$0x1f]  ;;  %s1641_s13 = smov 48   ;;  %s1642_s0 = smov 64  }
  0x16   :  { %79 = vmatpush.msra.mxu0 %v46_v19  ;;  %v111_v28 = vrot.slane %v109_v26, 1  ;;  %v114_v29 = vrot.slane %v109_v26, 5  ;;  %v120_v34 = vrot.slane %v109_v26, 3  ;;  %v1516_v9 = vld [vmem:[%s2215_s3] ss:$0 sm:$0xff]  ;;  %s1643_s18 = smov 16  }
  0x17   :  { %v1517_v13 = vld [vmem:[%s2215_s3 + $0x1] ss:$0 sm:$0xff] }
  0x18   :  { %80 = vmatpush.msra.mxu0 %v45_v20 }
  0x1a   :  { %81 = vmatpush.msra.mxu0 %v44_v21  ;;  %v1537_v43 = vpop.eup %1536 }
  0x1b   :  { %v142_v44 = vmul.f32 32.0, %v1537_v43  ;;  %vm146_vm6 = vweird.f32 %v1537_v43 }
  0x1c   :  { %82 = vmatpush.msra.mxu0 %v43_v22 }
  0x1d   :  { %v143_v45 = vsub.f32 1.0, %v142_v44 }
  0x1e   :  { %83 = vmatpush.msra.mxu0 %v42_v23 }
  0x1f   :  { %v144_v46 = vmul.f32 %v1537_v43, %v143_v45 }
  0x20   :  { %84 = vmatpush.msra.mxu0 %v41_v24 }
  0x21   :  { %85 = vmatmul.f32.vlgmr.msra.gmra.mxu0 %v39_v25  ;;  %v145_v47 = vadd.f32 %v1537_v43, %v144_v46 }
  0x23   :  { %v1790_v48 = vsel %vm146_vm6, %v1537_v43, %v145_v47 }
  0x91   :  { %v106_v27 = vpop.f32.mrf.mxu1 }
  0x9e   :  { %v86_v30 = vpop.f32.mrf.mxu0 }
  0x9f   :  { %v107_v31 = vadd.f32 %v106_v27, %v86_v30 }
  0xa1   :  { %v113_v32 = vadd.f32 %v111_v28, %v107_v31  ;;  %v116_v33 = vadd.f32 %v114_v29, %v107_v31 }
  0xa3   :  { %v118_v35 = vrot.slane %v113_v32, 7  ;;  %v123_v36 = vrot.slane %v116_v33, 6 }
  0xa5   :  { %v126_v37 = vsel %vm2224_vm1, %v109_v26, %v118_v35  ;;  %v138_v41 = vsel %vm137_vm5, %v123_v36, 0.0  ;;  %v278_v35 = vld [vmem:[%s2216_s4 + $0x18] sm:$0xff] }
  0xa6   :  { %v128_v38 = vsel %vm127_vm2, %v126_v37, %v120_v34  ;;  %301 = vmatpush.msra.mxu2 %v278_v35  ;;  %v276_v37 = vld [vmem:[%s2216_s4 + $0x8] sm:$0xff] }
  0xa7   :  { %v130_v39 = vsel %vm129_vm3, %v128_v38, %v123_v36  ;;  %v275_v38 = vld [vmem:[%s2216_s4] sm:$0xff] }
  0xa8   :  { %v134_v40 = vsel %vm133_vm4, %v130_v39, 0.0 }
  0xa9   :  { %135 = vadd.xlane.f32.xlu0 %v134_v40 }
  0xb1   :  { %139 = vadd.xlane.f32.xlu0 %v138_v41 }
 0x11c   :  { %v136_v49 = vpop.xlane.xlu0 %135 }
 0x11d   :  { %v148_v50 = vmul.f32 %v1790_v48, %v136_v49 }
 0x11f   :  { %v150_v51 = vsub.f32 %v130_v39, %v148_v50 }
 0x121   :  { %v152_v52 = vmul.f32 %v150_v51, %v150_v51 }
 0x123   :  { %v154_v53 = vsel %vm133_vm4, %v152_v52, 0.0 }
 0x124   :  { %155 = vadd.xlane.f32.xlu1 %v154_v53  ;;  %v140_v54 = vpop.xlane.xlu0 %139 }
 0x125   :  { %v149_v55 = vmul.f32 %v1790_v48, %v140_v54  ;;  %v1518_v54 = vld [vmem:[%s2215_s3 + $0x4] ss:$0 sm:$0xff] }
 0x127   :  { %v151_v56 = vsub.f32 %v123_v36, %v149_v55  ;;  %v277_v36 = vld [vmem:[%s2216_s4 + $0x10] sm:$0xff] }
 0x128   :  { %302 = vmatpush.msra.mxu2 %v277_v36 }
 0x129   :  { %v153_v57 = vmul.f32 %v151_v56, %v151_v56 }
 0x12a   :  { %303 = vmatpush.msra.mxu2 %v276_v37 }
 0x12b   :  { %v157_v58 = vsel %vm137_vm5, %v153_v57, 0.0 }
 0x12c   :  { %158 = vadd.xlane.f32.xlu1 %v157_v58  ;;  %304 = vmatpush.msra.mxu2 %v275_v38  ;;  %v1519_v58 = vld [vmem:[%s2215_s3 + $0x5] ss:$0 sm:$0xff] }
 0x197   :  { %v156_v59 = vpop.xlane.xlu1 %155 }
 0x198   :  { %v160_v60 = vmul.f32 %v156_v59, %v1790_v48 }
 0x19a   :  { %v162_v61 = vadd.f32 1e-05, %v160_v60 }
 0x19c   :  { %1538 = vrsqrt.f32 %v162_v61  ;;  %vm170_vm8 = vweird.f32 %v162_v61 }
 0x19f   :  { %v159_v62 = vpop.xlane.xlu1 %158 }
 0x1a0   :  { %v161_v63 = vmul.f32 %v159_v62, %v1790_v48 }
 0x1a2   :  { %v1539_v0 = vpop.eup %1538  ;;  %v163_v1 = vadd.f32 1e-05, %v161_v63 }
 0x1a3   :  { %v165_v2 = vmul.f32 %v1539_v0, %v162_v61  ;;  %vm171_vm7 = vweird.f32 %v1539_v0 }
 0x1a4   :  { %1540 = vrsqrt.f32 %v163_v1  ;;  %vm172_vm9 = vmor %vm170_vm8, %vm171_vm7  ;;  %vm180_vm11 = vweird.f32 %v163_v1  ;;  %vm318_vm7 = vcmask 130048  }
 0x1a5   :  { %v166_v3 = vmul.f32 %v1539_v0, %v165_v2 }
 0x1a7   :  { %v167_v4 = vmul.f32 0.5, %v166_v3 }
 0x1a9   :  { %v168_v5 = vsub.f32 1.5, %v167_v4  ;;  %v1520_v4 = vld [vmem:[%s2217_s5] ss:$0 sm:$0xff] }
 0x1aa   :  { %v1541_v6 = vpop.eup %1540 }
 0x1ab   :  { %v169_v7 = vmul.f32 %v1539_v0, %v168_v5  ;;  %v175_v8 = vmul.f32 %v1541_v6, %v163_v1  ;;  %vm181_vm10 = vweird.f32 %v1541_v6 }
 0x1ac   :  { %vm182_vm12 = vmor %vm180_vm11, %vm181_vm10 }
 0x1ad   :  { %v173_v10 = vsel %vm172_vm9, %v1539_v0, %v169_v7  ;;  %v176_v11 = vmul.f32 %v1541_v6, %v175_v8 }
 0x1ae   :  { %v184_v12 = vmul.f32 %v173_v10, %v150_v51 }
 0x1af   :  { %v177_v14 = vmul.f32 0.5, %v176_v11 }
 0x1b0   :  { %v187_v15 = vmul.f32 %v1516_v9, %v184_v12 }
 0x1b1   :  { %v178_v16 = vsub.f32 1.5, %v177_v14 }
 0x1b2   :  { %v1804_v17 = vadd.f32 %v1517_v13, %v187_v15  ;;  %v192_v15 = vlaneseq }
 0x1b3   :  { %v179_v18 = vmul.f32 %v1541_v6, %v178_v16 }
 0x1b4   :  { %v225_v19 = vsel %vm133_vm4, %v1804_v17, 0.0  ;;  %v196_v16 = vand.u32 127, %v192_v15 }
 0x1b5   :  { %v183_v20 = vsel %vm182_vm12, %v1541_v6, %v179_v18  ;;  %226 = vadd.xlane.f32.xlu2 %v225_v19  ;;  %v193_v18 = vshrl.u32 %v192_v15, 7 }
 0x1b6   :  { %v185_v21 = vmul.f32 %v183_v20, %v151_v56  ;;  %vm214_vm8 = vcmp.ge.s32.totalorder %v196_v16, 5  ;;  %vm215_vm9 = vcmp.lt.s32.totalorder %v196_v16, 10  ;;  %vm204_vm11 = vcmp.lt.s32.totalorder %v196_v16, 5 }
 0x1b7   :  { %vm199_vm10 = vcmp.lt.s32.totalorder %v193_v18, 5  ;;  %vm208_vm12 = vcmp.ge.s32.totalorder %v193_v18, 5  ;;  %v194_v19 = vadd.s32 8, %v193_v18  ;;  %v1640_v20 = vmov -1e+30  }
 0x1b8   :  { %v188_v22 = vmul.f32 %v1516_v9, %v185_v21 }
 0x1ba   :  { %v1808_v23 = vadd.f32 %v1517_v13, %v188_v22 }
 0x1bc   :  { %v228_v24 = vsel %vm137_vm5, %v1808_v23, 0.0 }
 0x1bd   :  { %229 = vadd.xlane.f32.xlu2 %v228_v24 }
 0x228   :  { %v227_v25 = vpop.xlane.xlu2 %226 }
 0x229   :  { %v231_v26 = vmul.f32 %v227_v25, %v1790_v48 }
 0x22b   :  { %v233_v27 = vsub.f32 %v1804_v17, %v231_v26 }
 0x22d   :  { %v235_v28 = vmul.f32 %v233_v27, %v233_v27 }
 0x22f   :  { %v237_v29 = vsel %vm133_vm4, %v235_v28, 0.0 }
 0x230   :  { %238 = vadd.xlane.f32.xlu0 %v237_v29  ;;  %v230_v30 = vpop.xlane.xlu2 %229 }
 0x231   :  { %v232_v31 = vmul.f32 %v230_v30, %v1790_v48 }
 0x233   :  { %v234_v32 = vsub.f32 %v1808_v23, %v232_v31 }
 0x235   :  { %v236_v33 = vmul.f32 %v234_v32, %v234_v32 }
 0x237   :  { %v240_v34 = vsel %vm137_vm5, %v236_v33, 0.0 }
 0x238   :  { %241 = vadd.xlane.f32.xlu1 %v240_v34 }
 0x2a3   :  { %v239_v39 = vpop.xlane.xlu0 %238 }
 0x2a4   :  { %v243_v40 = vmul.f32 %v239_v39, %v1790_v48 }
 0x2a6   :  { %v245_v41 = vadd.f32 1e-05, %v243_v40 }
 0x2a8   :  { %1542 = vrsqrt.f32 %v245_v41  ;;  %vm253_vm14 = vweird.f32 %v245_v41 }
 0x2ab   :  { %v242_v42 = vpop.xlane.xlu1 %241 }
 0x2ac   :  { %v244_v43 = vmul.f32 %v242_v42, %v1790_v48 }
 0x2ae   :  { %v1543_v44 = vpop.eup %1542  ;;  %v246_v45 = vadd.f32 1e-05, %v244_v43 }
 0x2af   :  { %v248_v46 = vmul.f32 %v1543_v44, %v245_v41  ;;  %vm254_vm13 = vweird.f32 %v1543_v44 }
 0x2b0   :  { %1544 = vrsqrt.f32 %v246_v45  ;;  %vm255_vm15 = vmor %vm253_vm14, %vm254_vm13  ;;  %vm263_vm3 = vweird.f32 %v246_v45 }
 0x2b1   :  { %v249_v47 = vmul.f32 %v1543_v44, %v248_v46  ;;  %vm216_vm13 = vmand %vm214_vm8, %vm215_vm9  ;;  %vm354_vm8 = vcmask 74752  }
 0x2b2   :  { %vm206_vm14 = vmand %vm199_vm10, %vm204_vm11 }
 0x2b3   :  { %v250_v49 = vmul.f32 0.5, %v249_v47 }
 0x2b5   :  { %v251_v50 = vsub.f32 1.5, %v250_v49 }
 0x2b6   :  { %v1545_v51 = vpop.eup %1544 }
 0x2b7   :  { %v252_v52 = vmul.f32 %v1543_v44, %v251_v50  ;;  %v258_v53 = vmul.f32 %v1545_v51, %v246_v45  ;;  %vm264_vm2 = vweird.f32 %v1545_v51 }
 0x2b8   :  { %vm265_vm6 = vmor %vm263_vm3, %vm264_vm2  ;;  %vm350_vm3 = vcmask 80896  }
 0x2b9   :  { %v256_v55 = vsel %vm255_vm15, %v1543_v44, %v252_v52  ;;  %v259_v56 = vmul.f32 %v1545_v51, %v258_v53  ;;  %vm217_vm15 = vmand %vm208_vm12, %vm216_vm13  ;;  %vm411_vm12 = vcmask 1041408  }
 0x2ba   :  { %v267_v57 = vmul.f32 %v256_v55, %v233_v27  ;;  %vm219_vm2 = vmor %vm206_vm14, %vm217_vm15 }
 0x2bb   :  { %v260_v59 = vmul.f32 0.5, %v259_v56  ;;  %v1869_v21 = vsel %vm219_vm2, 0.0, %v1640_v20 }
 0x2bc   :  { %v270_v60 = vmul.f32 %v1518_v54, %v267_v57 }
 0x2bd   :  { %v261_v61 = vsub.f32 1.5, %v260_v59 }
 0x2be   :  { %v273_v62 = vadd.f32 %v1519_v58, %v270_v60 }
 0x2bf   :  { %v262_v63 = vmul.f32 %v1545_v51, %v261_v61 }
 0x2c0   :  { %1436 = vmatmul.msk.f32.vlgmr.msra.gmra.mxu2 %vm133_vm4, %v273_v62 }
 0x2c1   :  { %v266_v0 = vsel %vm265_vm6, %v1545_v51, %v262_v63  ;;  %vm211_vm6 = vcmp.lt.s32.totalorder %v194_v19, 10 }
 0x2c2   :  { %v268_v1 = vmul.f32 %v266_v0, %v234_v32  ;;  %vm218_vm1 = vmand %vm211_vm6, %vm216_vm13 }
 0x2c3   :  { %v1873_v26 = vsel %vm218_vm1, 0.0, %v1640_v20 }
 0x2c4   :  { %v271_v2 = vmul.f32 %v1518_v54, %v268_v1 }
 0x2c6   :  { %v274_v3 = vadd.f32 %v1519_v58, %v271_v2 }
 0x2c8   :  { %1437 = vmatmul.msk.f32.gmra.mxu2 %vm133_vm4, %v274_v3 }
 0x343   :  { %v306_v5 = vpop.f32.mrf.mxu2 }
 0x344   :  { %v1843_v6 = vadd.f32 %v1520_v4, %v306_v5 }
 0x346   :  { %437 = vrot.lane.b32.xlu1 %v1843_v6, %s1637_s29  ;;  %441 = vrot.lane.b32.xlu0 %v1843_v6, %s1638_s30 }
 0x34b   :  { %v309_v7 = vpop.f32.mrf.mxu2 }
 0x34c   :  { %v1849_v8 = vadd.f32 %v1520_v4, %v309_v7 }
 0x34e   :  { %443 = vrot.lane.b32.xlu2 %v1849_v8, %s1638_s30  ;;  %316 = vrot.lane.b32.xlu0 %v1849_v8, %s1639_s12 }
 0x356   :  { %439 = vrot.lane.b32.xlu2 %v1849_v8, %s1637_s29 }
 0x35e   :  { %314 = vrot.lane.b32.xlu2 %v1843_v6, %s1639_s12 }
 0x3a8   :  { %v444_v9 = vpop.permute.xlu2 %443 }
 0x3a9   :  { %1445 = vmatpush.xpose.msk.msrb.mxu2 %vm318_vm7, %v444_v9 }
 0x3b0   :  { %v440_v11 = vpop.permute.xlu2 %439 }
 0x3b8   :  { %v442_v10 = vpop.permute.xlu0 %441  ;;  %v438_v12 = vpop.permute.xlu1 %437 }
 0x3b9   :  { %1446 = vmatpush.xpose.msk.msrb.mxu2 %vm318_vm7, %v442_v10  ;;  %v315_v14 = vpop.permute.xlu2 %314 }
 0x3bc   :  { %1447 = vmatmul.msk.f32.vlgmr.msrb.gmra.mxu2 %vm318_vm7, %v438_v12 }
 0x3c0   :  { %v317_v13 = vpop.permute.xlu0 %316 }
 0x3c1   :  { %1438 = vmatpush.xpose.msk.msra.mxu3 %vm318_vm7, %v317_v13 }
 0x3c4   :  { %1448 = vmatmul.msk.f32.gmra.mxu2 %vm318_vm7, %v440_v11 }
 0x3c5   :  { %1439 = vmatpush.xpose.msk.msra.mxu3 %vm318_vm7, %v315_v14 }
 0x3c8   :  { %1440 = vmatmul.msk.f32.vlgmr.msra.gmra.mxu3 %vm318_vm7, %v1843_v6 }
 0x3d0   :  { %1441 = vmatmul.msk.f32.gmra.mxu3 %vm318_vm7, %v1849_v8 }
 0x43f   :  { %v470_v22 = vpop.f32.mrf.mxu2 }
 0x440   :  { %v471_v24 = vadd.f32 %v470_v22, %v1869_v21 }
 0x442   :  { %v476_v25 = vsel %vm350_vm3, %v471_v24, -inf }
 0x443   :  { %477 = vmax.xlane.f32.xlu1 %v476_v25 }
 0x447   :  { %v473_v27 = vpop.f32.mrf.mxu2 }
 0x448   :  { %v474_v28 = vadd.f32 %v473_v27, %v1873_v26 }
 0x44a   :  { %v479_v29 = vsel %vm354_vm8, %v474_v28, -inf }
 0x44b   :  { %480 = vmax.xlane.f32.xlu0 %v479_v29  ;;  %v344_v30 = vpop.f32.mrf.mxu3 }
 0x44c   :  { %v345_v31 = vadd.f32 %v344_v30, %v1869_v21 }
 0x44e   :  { %v351_v32 = vsel %vm350_vm3, %v345_v31, -inf }
 0x44f   :  { %352 = vmax.xlane.f32.xlu2 %v351_v32 }
 0x453   :  { %v347_v33 = vpop.f32.mrf.mxu3 }
 0x454   :  { %v348_v34 = vadd.f32 %v347_v33, %v1873_v26 }
 0x456   :  { %v355_v35 = vsel %vm354_vm8, %v348_v34, -inf }
 0x457   :  { %356 = vmax.xlane.f32.xlu0 %v355_v35 }
 0x46b   :  { %524 = vrot.lane.b32.xlu0 %v1843_v6, %s1641_s13 }
 0x473   :  { %400 = vrot.lane.b32.xlu0 %v1843_v6, %s1642_s0 }
 0x4b6   :  { %v478_v36 = vpop.xlane.xlu1 %477 }
 0x4b7   :  { %v482_v37 = vsub.f32 %v471_v24, %v478_v36 }
 0x4b9   :  { %v484_v38 = vmul.f32 1.442695, %v482_v37 }
 0x4bb   :  { %1546 = vpow2.f32 %v484_v38 }
 0x4be   :  { %v481_v39 = vpop.xlane.xlu0 %480 }
 0x4bf   :  { %v483_v40 = vsub.f32 %v474_v28, %v481_v39 }
 0x4c1   :  { %v1547_v41 = vpop.eup %1546  ;;  %v486_v42 = vmul.f32 1.442695, %v483_v40 }
 0x4c2   :  { %v353_v43 = vpop.xlane.xlu2 %352  ;;  %v488_v44 = vsel %vm350_vm3, %v1547_v41, 0.0 }
 0x4c3   :  { %1548 = vpow2.f32 %v486_v42  ;;  %v358_v45 = vsub.f32 %v345_v31, %v353_v43  ;;  %489 = vadd.xlane.f32.xlu1 %v488_v44 }
 0x4c5   :  { %v360_v46 = vmul.f32 1.442695, %v358_v45 }
 0x4c7   :  { %1550 = vpow2.f32 %v360_v46 }
 0x4c9   :  { %v1886_v47 = vpop.eup %1548 }
 0x4ca   :  { %v357_v49 = vpop.xlane.xlu0 %356  ;;  %v491_v50 = vsel %vm354_vm8, %v1886_v47, 0.0 }
 0x4cb   :  { %v359_v51 = vsub.f32 %v348_v34, %v357_v49  ;;  %492 = vadd.xlane.f32.xlu2 %v491_v50 }
 0x4cd   :  { %v362_v52 = vmul.f32 1.442695, %v359_v51  ;;  %v1890_v53 = vpop.eup %1550  ;;  %v572_v51 = vld [vmem:[%s2218_s6 + $0x10] sm:$0xff] }
 0x4ce   :  { %v364_v54 = vsel %vm350_vm3, %v1890_v53, 0.0 }
 0x4cf   :  { %1552 = vpow2.f32 %v362_v52  ;;  %v571_v52 = vld [vmem:[%s2218_s6 + $0x8] sm:$0xff] }
 0x4d3   :  { %365 = vadd.xlane.f32.xlu2 %v364_v54 }
 0x4d5   :  { %v1894_v55 = vpop.eup %1552 }
 0x4d6   :  { %v367_v56 = vsel %vm354_vm8, %v1894_v55, 0.0 }
 0x4db   :  { %368 = vadd.xlane.f32.xlu2 %v367_v56 }
 0x4dc   :  { %526 = vrot.lane.b32.xlu1 %v1849_v8, %s1641_s13 }
 0x4dd   :  { %v525_v10 = vpop.permute.xlu0 %524 }
 0x4e5   :  { %v401_v37 = vpop.permute.xlu0 %400 }
 0x4f3   :  { %402 = vrot.lane.b32.xlu2 %v1849_v8, %s1642_s0 }
 0x536   :  { %v490_v57 = vpop.xlane.xlu1 %489 }
 0x537   :  { %1554 = vrcp.f32 %v490_v57  ;;  %v505_v3 = vand.u32 2147483648, %v490_v57  ;;  %vm499_vm9 = vweird.f32 %v490_v57  ;;  %v503_v4 = vand.u32 2147483647, %v490_v57 }
 0x539   :  { %v506_v8 = vor.u32 1.1754944e-38, %v505_v3  ;;  %vm504_vm11 = vcmp.eq.f32.partialorder %v503_v4, 8.507059e+37 }
 0x53d   :  { %v1555_v58 = vpop.eup %1554 }
 0x53e   :  { %v495_v59 = vmul.f32 %v1555_v58, %v490_v57  ;;  %v493_v60 = vpop.xlane.xlu2 %492  ;;  %vm500_vm1 = vweird.f32 %v1555_v58 }
 0x53f   :  { %1556 = vrcp.f32 %v493_v60  ;;  %vm501_vm10 = vmor %vm499_vm9, %vm500_vm1  ;;  %v520_v16 = vand.u32 2147483648, %v493_v60  ;;  %vm514_vm14 = vweird.f32 %v493_v60  ;;  %v518_v20 = vand.u32 2147483647, %v493_v60 }
 0x540   :  { %v496_v61 = vsub.f32 1.0, %v495_v59 }
 0x541   :  { %v521_v28 = vor.u32 1.1754944e-38, %v520_v16  ;;  %vm519_vm1 = vcmp.eq.f32.partialorder %v518_v20, 8.507059e+37  ;;  %v663_v16 = vld [vmem:[%s2219_s7 + $0x10] sm:$0xff] }
 0x542   :  { %v497_v62 = vmul.f32 %v1555_v58, %v496_v61 }
 0x544   :  { %v498_v0 = vadd.f32 %v1555_v58, %v497_v62  ;;  %v1521_v62 = vld [vmem:[%s2215_s3 + $0x6] ss:$0 sm:$0xff] }
 0x545   :  { %v1557_v63 = vpop.eup %1556 }
 0x546   :  { %v510_v1 = vmul.f32 %v1557_v63, %v493_v60  ;;  %v366_v2 = vpop.xlane.xlu2 %365  ;;  %v502_v7 = vsel %vm501_vm10, %v1555_v58, %v498_v0  ;;  %vm515_vm13 = vweird.f32 %v1557_v63 }
 0x547   :  { %1558 = vrcp.f32 %v366_v2  ;;  %v507_v11 = vsel %vm504_vm11, %v506_v8, %v502_v7  ;;  %v381_v22 = vand.u32 2147483648, %v366_v2  ;;  %vm516_vm15 = vmor %vm514_vm14, %vm515_vm13  ;;  %v379_v25 = vand.u32 2147483647, %v366_v2 }
 0x548   :  { %v511_v5 = vsub.f32 1.0, %v510_v1  ;;  %v508_v19 = vmul.f32 %v1547_v41, %v507_v11  ;;  %vm375_vm6 = vweird.f32 %v366_v2 }
 0x549   :  { %v382_v31 = vor.u32 1.1754944e-38, %v381_v22  ;;  %vm380_vm10 = vcmp.eq.f32.partialorder %v379_v25, 8.507059e+37 }
 0x54a   :  { %v512_v6 = vmul.f32 %v1557_v63, %v511_v5 }
 0x54c   :  { %v513_v15 = vadd.f32 %v1557_v63, %v512_v6 }
 0x54d   :  { %v1559_v9 = vpop.eup %1558 }
 0x54e   :  { %v371_v12 = vmul.f32 %v1559_v9, %v366_v2  ;;  %v527_v13 = vpop.permute.xlu1 %526  ;;  %v369_v14 = vpop.xlane.xlu2 %368  ;;  %vm376_vm2 = vweird.f32 %v1559_v9  ;;  %v517_v27 = vsel %vm516_vm15, %v1557_v63, %v513_v15  ;;  %v664_v15 = vld [vmem:[%s2219_s7 + $0x18] sm:$0xff] }
 0x54f   :  { %1560 = vrcp.f32 %v369_v14  ;;  %1449 = vmatpush.msk.msrb.mxu3 %vm411_vm12, %v527_v13  ;;  %vm377_vm9 = vmor %vm375_vm6, %vm376_vm2  ;;  %v522_v32 = vsel %vm519_vm1, %v521_v28, %v517_v27  ;;  %v396_v41 = vand.u32 2147483648, %v369_v14  ;;  %v394_v43 = vand.u32 2147483647, %v369_v14 }
 0x550   :  { %v372_v18 = vsub.f32 1.0, %v371_v12  ;;  %v523_v40 = vmul.f32 %v1886_v47, %v522_v32  ;;  %vm390_vm13 = vweird.f32 %v369_v14  ;;  %v573_v47 = vld [vmem:[%s2218_s6 + $0x18] sm:$0xff] }
 0x551   :  { %552 = vmatpush.msrb.mxu3 %v525_v10  ;;  %v397_v45 = vor.u32 1.1754944e-38, %v396_v41  ;;  %vm395_vm15 = vcmp.eq.f32.partialorder %v394_v43, 8.507059e+37  ;;  %592 = vmatpush.msrb.mxu0 %v573_v47  ;;  %v1523_v41 = vld [vmem:[%s2215_s3 + $0x8] ss:$0 sm:$0xff] }
 0x552   :  { %v373_v24 = vmul.f32 %v1559_v9, %v372_v18  ;;  %1450 = vmatmul.msk.f32.vlgmr.msrb.gmra.mxu3 %vm350_vm3, %v508_v19  ;;  %v662_v18 = vld [vmem:[%s2219_s7 + $0x8] sm:$0xff]  ;;  %v661_v19 = vld [vmem:[%s2219_s7] sm:$0xff] }
 0x553   :  { %593 = vmatpush.msrb.mxu0 %v572_v51 }
 0x554   :  { %v374_v29 = vadd.f32 %v1559_v9, %v373_v24 }
 0x555   :  { %v1561_v30 = vpop.eup %1560  ;;  %594 = vmatpush.msrb.mxu0 %v571_v52  ;;  %v747_v52 = vld [vmem:[%s2221_s9 + $0x38] sm:$0xff] }
 0x556   :  { %v386_v33 = vmul.f32 %v1561_v30, %v369_v14  ;;  %v403_v34 = vpop.permute.xlu2 %402  ;;  %v378_v35 = vsel %vm377_vm9, %v1559_v9, %v374_v29  ;;  %vm391_vm11 = vweird.f32 %v1561_v30  ;;  %762 = vmatpush.msra.mxu2 %v747_v52 }
 0x557   :  { %1442 = vmatpush.msk.msrb.mxu1 %vm411_vm12, %v403_v34  ;;  %v383_v36 = vsel %vm380_vm10, %v382_v31, %v378_v35  ;;  %vm392_vm14 = vmor %vm390_vm13, %vm391_vm11 }
 0x558   :  { %v387_v38 = vsub.f32 1.0, %v386_v33  ;;  %v384_v39 = vmul.f32 %v1890_v53, %v383_v36 }
 0x559   :  { %429 = vmatpush.msrb.mxu1 %v401_v37  ;;  %v1522_v37 = vld [vmem:[%s2215_s3 + $0x7] ss:$0 sm:$0xff] }
 0x55a   :  { %v388_v42 = vmul.f32 %v1561_v30, %v387_v38  ;;  %1443 = vmatmul.msk.f32.vlgmr.msrb.gmra.mxu1 %vm350_vm3, %v384_v39  ;;  %1451 = vmatmul.msk.f32.gmra.mxu3 %vm350_vm3, %v523_v40 }
 0x55b   :  { %687 = vmatpush.msra.mxu1 %v664_v15 }
 0x55c   :  { %v389_v44 = vadd.f32 %v1561_v30, %v388_v42 }
 0x55d   :  { %688 = vmatpush.msra.mxu1 %v663_v16 }
 0x55e   :  { %v393_v46 = vsel %vm392_vm14, %v1561_v30, %v389_v44 }
 0x55f   :  { %v398_v49 = vsel %vm395_vm15, %v397_v45, %v393_v46  ;;  %689 = vmatpush.msra.mxu1 %v662_v18 }
 0x560   :  { %v399_v50 = vmul.f32 %v1894_v55, %v398_v49  ;;  %v570_v55 = vld [vmem:[%s2218_s6] sm:$0xff] }
 0x561   :  { %595 = vmatpush.msrb.mxu0 %v570_v55  ;;  %690 = vmatpush.msra.mxu1 %v661_v19  ;;  %v744_v55 = vld [vmem:[%s2221_s9 + $0x20] sm:$0xff] }
 0x562   :  { %1444 = vmatmul.msk.f32.gmra.mxu1 %vm350_vm3, %v399_v50 }
 0x5d5   :  { %v554_v53 = vpop.f32.mrf.mxu3 }
 0x5d6   :  { %562 = vrot.lane.b32.xlu1 %v554_v53, %s1643_s18  ;;  %v746_v53 = vld [vmem:[%s2221_s9 + $0x30] sm:$0xff] }
 0x5d7   :  { %v431_v56 = vpop.f32.mrf.mxu1  ;;  %763 = vmatpush.msra.mxu2 %v746_v53  ;;  %v1463_v53 = vld [vmem:[%s2216_s4 + $0x38] sm:$0xff] }
 0x5d8   :  { %863 = vmatpush.msra.mxu3 %v1463_v53 }
 0x5dd   :  { %v557_v54 = vpop.f32.mrf.mxu3 }
 0x5de   :  { %564 = vrot.lane.b32.xlu0 %v557_v54, %s1643_s18  ;;  %v745_v54 = vld [vmem:[%s2221_s9 + $0x28] sm:$0xff] }
 0x5df   :  { %v434_v59 = vpop.f32.mrf.mxu1  ;;  %764 = vmatpush.msra.mxu2 %v745_v54  ;;  %v1462_v54 = vld [vmem:[%s2216_s4 + $0x30] sm:$0xff] }
 0x5e0   :  { %864 = vmatpush.msra.mxu3 %v1462_v54 }
 0x5e1   :  { %765 = vmatpush.msra.mxu2 %v744_v55  ;;  %v1461_v55 = vld [vmem:[%s2216_s4 + $0x28] sm:$0xff] }
 0x5e2   :  { %865 = vmatpush.msra.mxu3 %v1461_v55 }
 0x648   :  { %v563_v57 = vpop.permute.xlu1 %562 }
 0x649   :  { %v568_v58 = vsel %vm318_vm7, %v431_v56, %v563_v57  ;;  %v743_v56 = vld [vmem:[%s2221_s9 + $0x18] sm:$0xff]  ;;  %v1524_v57 = vld [vmem:[%s2220_s8] ss:$0 sm:$0xff] }
 0x64a   :  { %1452 = vmatmul.msk.f32.vlgmr.msrb.gmra.mxu0 %vm133_vm4, %v568_v58  ;;  %766 = vmatpush.msra.mxu2 %v743_v56  ;;  %v742_v58 = vld [vmem:[%s2221_s9 + $0x10] sm:$0xff]  ;;  %v1460_v56 = vld [vmem:[%s2216_s4 + $0x20] sm:$0xff] }
 0x64b   :  { %866 = vmatpush.msra.mxu3 %v1460_v56 }
 0x64c   :  { %767 = vmatpush.msra.mxu2 %v742_v58 }
 0x650   :  { %v565_v60 = vpop.permute.xlu0 %564 }
 0x651   :  { %v569_v61 = vsel %vm318_vm7, %v434_v59, %v565_v60  ;;  %v741_v60 = vld [vmem:[%s2221_s9 + $0x8] sm:$0xff] }
 0x652   :  { %1453 = vmatmul.msk.f32.gmra.mxu0 %vm133_vm4, %v569_v61  ;;  %768 = vmatpush.msra.mxu2 %v741_v60 }
 0x6c7   :  { %v597_v63 = vpop.f32.mrf.mxu0 }
 0x6c8   :  { %v603_v0 = vadd.f32 %v597_v63, %v1804_v17 }
 0x6ca   :  { %v1933_v1 = vadd.f32 %v1521_v62, %v603_v0 }
 0x6cc   :  { %v611_v2 = vsel %vm133_vm4, %v1933_v1, 0.0 }
 0x6cd   :  { %612 = vadd.xlane.f32.xlu1 %v611_v2 }
 0x6cf   :  { %v600_v3 = vpop.f32.mrf.mxu0 }
 0x6d0   :  { %v604_v4 = vadd.f32 %v600_v3, %v1808_v23 }
 0x6d2   :  { %v1938_v5 = vadd.f32 %v1521_v62, %v604_v4  ;;  %v740_v62 = vld [vmem:[%s2221_s9] sm:$0xff] }
 0x6d3   :  { %769 = vmatpush.msra.mxu2 %v740_v62 }
 0x6d4   :  { %v614_v6 = vsel %vm137_vm5, %v1938_v5, 0.0 }
 0x6d5   :  { %615 = vadd.xlane.f32.xlu0 %v614_v6 }
 0x740   :  { %v613_v7 = vpop.xlane.xlu1 %612 }
 0x741   :  { %v617_v8 = vmul.f32 %v613_v7, %v1790_v48 }
 0x743   :  { %v619_v17 = vsub.f32 %v1933_v1, %v617_v8 }
 0x745   :  { %v621_v9 = vmul.f32 %v619_v17, %v619_v17 }
 0x747   :  { %v623_v10 = vsel %vm133_vm4, %v621_v9, 0.0 }
 0x748   :  { %624 = vadd.xlane.f32.xlu2 %v623_v10  ;;  %v616_v11 = vpop.xlane.xlu0 %615 }
 0x749   :  { %v618_v12 = vmul.f32 %v616_v11, %v1790_v48 }
 0x74b   :  { %v620_v23 = vsub.f32 %v1938_v5, %v618_v12 }
 0x74d   :  { %v622_v13 = vmul.f32 %v620_v23, %v620_v23 }
 0x74f   :  { %v626_v14 = vsel %vm137_vm5, %v622_v13, 0.0 }
 0x750   :  { %627 = vadd.xlane.f32.xlu1 %v626_v14 }
 0x7bb   :  { %v625_v20 = vpop.xlane.xlu2 %624 }
 0x7bc   :  { %v629_v22 = vmul.f32 %v625_v20, %v1790_v48 }
 0x7be   :  { %v631_v24 = vadd.f32 1e-05, %v629_v22 }
 0x7c0   :  { %1562 = vrsqrt.f32 %v631_v24  ;;  %vm639_vm6 = vweird.f32 %v631_v24 }
 0x7c3   :  { %v628_v25 = vpop.xlane.xlu1 %627 }
 0x7c4   :  { %v630_v27 = vmul.f32 %v628_v25, %v1790_v48 }
 0x7c6   :  { %v1563_v28 = vpop.eup %1562  ;;  %v632_v29 = vadd.f32 1e-05, %v630_v27 }
 0x7c7   :  { %v634_v30 = vmul.f32 %v1563_v28, %v631_v24  ;;  %vm640_vm2 = vweird.f32 %v1563_v28 }
 0x7c8   :  { %1564 = vrsqrt.f32 %v632_v29  ;;  %vm641_vm1 = vmor %vm639_vm6, %vm640_vm2  ;;  %vm649_vm10 = vweird.f32 %v632_v29 }
 0x7c9   :  { %v635_v31 = vmul.f32 %v1563_v28, %v634_v30 }
 0x7cb   :  { %v636_v32 = vmul.f32 0.5, %v635_v31 }
 0x7cd   :  { %v637_v33 = vsub.f32 1.5, %v636_v32 }
 0x7ce   :  { %v1565_v34 = vpop.eup %1564 }
 0x7cf   :  { %v638_v35 = vmul.f32 %v1563_v28, %v637_v33  ;;  %v644_v36 = vmul.f32 %v1565_v34, %v632_v29  ;;  %vm650_vm9 = vweird.f32 %v1565_v34 }
 0x7d0   :  { %vm651_vm11 = vmor %vm649_vm10, %vm650_vm9 }
 0x7d1   :  { %v642_v38 = vsel %vm641_vm1, %v1563_v28, %v638_v35  ;;  %v645_v39 = vmul.f32 %v1565_v34, %v644_v36  ;;  %v1525_v35 = vld [vmem:[%s2215_s3 + $0x9] ss:$0 sm:$0xff] }
 0x7d2   :  { %v653_v40 = vmul.f32 %v642_v38, %v619_v17 }
 0x7d3   :  { %v646_v42 = vmul.f32 0.5, %v645_v39 }
 0x7d4   :  { %v656_v43 = vmul.f32 %v1522_v37, %v653_v40 }
 0x7d5   :  { %v647_v44 = vsub.f32 1.5, %v646_v42 }
 0x7d6   :  { %v659_v45 = vadd.f32 %v1523_v41, %v656_v43 }
 0x7d7   :  { %v648_v46 = vmul.f32 %v1565_v34, %v647_v44 }
 0x7d8   :  { %1454 = vmatmul.msk.f32.vlgmr.msra.gmra.mxu1 %vm133_vm4, %v659_v45 }
 0x7d9   :  { %v652_v49 = vsel %vm651_vm11, %v1565_v34, %v648_v46 }
 0x7da   :  { %v654_v50 = vmul.f32 %v652_v49, %v620_v23 }
 0x7dc   :  { %v657_v47 = vmul.f32 %v1522_v37, %v654_v50 }
 0x7de   :  { %v660_v51 = vadd.f32 %v1523_v41, %v657_v47 }
 0x7e0   :  { %1455 = vmatmul.msk.f32.gmra.mxu1 %vm133_vm4, %v660_v51 }
 0x855   :  { %v692_v59 = vpop.f32.mrf.mxu1 }
 0x856   :  { %v693_v61 = vadd.f32 %v1524_v57, %v692_v59 }
 0x858   :  { %v1456_v63 = vmul.f32 -1.702, %v693_v61 }
 0x85a   :  { %v702_v0 = vmul.f32 1.442695, %v1456_v63 }
 0x85c   :  { %1566 = vpow2.f32 %v702_v0 }
 0x85d   :  { %v695_v2 = vpop.f32.mrf.mxu1 }
 0x85e   :  { %v696_v3 = vadd.f32 %v1524_v57, %v695_v2 }
 0x860   :  { %v1457_v4 = vmul.f32 -1.702, %v696_v3 }
 0x862   :  { %v1567_v6 = vpop.eup %1566  ;;  %v704_v7 = vmul.f32 1.442695, %v1457_v4 }
 0x863   :  { %v706_v8 = vadd.f32 1.0, %v1567_v6 }
 0x864   :  { %1568 = vpow2.f32 %v704_v7 }
 0x865   :  { %1570 = vrcp.f32 %v706_v8  ;;  %v719_v23 = vand.u32 2147483648, %v706_v8  ;;  %v717_v14 = vand.u32 2147483647, %v706_v8  ;;  %vm713_vm14 = vweird.f32 %v706_v8 }
 0x867   :  { %v720_v18 = vor.u32 1.1754944e-38, %v719_v23  ;;  %vm718_vm2 = vcmp.eq.f32.partialorder %v717_v14, 8.507059e+37 }
 0x86a   :  { %v1569_v17 = vpop.eup %1568 }
 0x86b   :  { %v1571_v9 = vpop.eup %1570  ;;  %v707_v10 = vadd.f32 1.0, %v1569_v17  ;;  %v1526_v17 = vld [vmem:[%s2215_s3 + $0xa] ss:$0 sm:$0xff] }
 0x86c   :  { %v709_v11 = vmul.f32 %v1571_v9, %v706_v8  ;;  %vm714_vm13 = vweird.f32 %v1571_v9 }
 0x86d   :  { %1572 = vrcp.f32 %v707_v10  ;;  %vm715_vm15 = vmor %vm713_vm14, %vm714_vm13  ;;  %v734_v27 = vand.u32 2147483648, %v707_v10  ;;  %v732_v29 = vand.u32 2147483647, %v707_v10  ;;  %vm728_vm1 = vweird.f32 %v707_v10 }
 0x86e   :  { %v710_v12 = vsub.f32 1.0, %v709_v11 }
 0x86f   :  { %v735_v31 = vor.u32 1.1754944e-38, %v734_v27  ;;  %vm733_vm10 = vcmp.eq.f32.partialorder %v732_v29, 8.507059e+37 }
 0x870   :  { %v711_v13 = vmul.f32 %v1571_v9, %v710_v12  ;;  %v1527_v12 = vld [vmem:[%s2215_s3 + $0xb] ss:$0 sm:$0xff] }
 0x872   :  { %v712_v15 = vadd.f32 %v1571_v9, %v711_v13 }
 0x873   :  { %v1573_v16 = vpop.eup %1572 }
 0x874   :  { %v716_v19 = vsel %vm715_vm15, %v1571_v9, %v712_v15  ;;  %v724_v20 = vmul.f32 %v1573_v16, %v707_v10  ;;  %vm729_vm6 = vweird.f32 %v1573_v16 }
 0x875   :  { %v721_v22 = vsel %vm718_vm2, %v720_v18, %v716_v19  ;;  %vm730_vm9 = vmor %vm728_vm1, %vm729_vm6 }
 0x876   :  { %v738_v24 = vmul.f32 %v721_v22, %v693_v61  ;;  %v725_v25 = vsub.f32 1.0, %v724_v20 }
 0x878   :  { %v726_v28 = vmul.f32 %v1573_v16, %v725_v25  ;;  %1458 = vmatmul.msk.f32.vlgmr.msra.gmra.mxu2 %vm65_vm0, %v738_v24  ;;  %v1528_v24 = vld [vmem:[%s2217_s5 + $0x1] ss:$0 sm:$0xff] }
 0x87a   :  { %v727_v30 = vadd.f32 %v1573_v16, %v726_v28 }
 0x87c   :  { %v731_v32 = vsel %vm730_vm9, %v1573_v16, %v727_v30 }
 0x87d   :  { %v736_v33 = vsel %vm733_vm10, %v735_v31, %v731_v32 }
 0x87e   :  { %v739_v34 = vmul.f32 %v736_v33, %v696_v3 }
 0x880   :  { %1459 = vmatmul.msk.f32.gmra.mxu2 %vm65_vm0, %v739_v34 }
 0x8fb   :  { %v771_v36 = vpop.f32.mrf.mxu2 }
 0x8fc   :  { %v777_v37 = vadd.f32 %v771_v36, %v1933_v1 }
 0x8fe   :  { %v2003_v38 = vadd.f32 %v1525_v35, %v777_v37 }
 0x900   :  { %v785_v39 = vsel %vm133_vm4, %v2003_v38, 0.0 }
 0x901   :  { %786 = vadd.xlane.f32.xlu0 %v785_v39 }
 0x903   :  { %v774_v40 = vpop.f32.mrf.mxu2 }
 0x904   :  { %v778_v41 = vadd.f32 %v774_v40, %v1938_v5 }
 0x906   :  { %v2008_v42 = vadd.f32 %v1525_v35, %v778_v41 }
 0x908   :  { %v788_v43 = vsel %vm137_vm5, %v2008_v42, 0.0 }
 0x909   :  { %789 = vadd.xlane.f32.xlu1 %v788_v43 }
 0x974   :  { %v787_v44 = vpop.xlane.xlu0 %786 }
 0x975   :  { %v791_v45 = vmul.f32 %v787_v44, %v1790_v48 }
 0x977   :  { %v793_v1 = vsub.f32 %v2003_v38, %v791_v45 }
 0x979   :  { %v795_v46 = vmul.f32 %v793_v1, %v793_v1 }
 0x97b   :  { %v797_v49 = vsel %vm133_vm4, %v795_v46, 0.0 }
 0x97c   :  { %v790_v50 = vpop.xlane.xlu1 %789  ;;  %798 = vadd.xlane.f32.xlu2 %v797_v49 }
 0x97d   :  { %v792_v47 = vmul.f32 %v790_v50, %v1790_v48 }
 0x97f   :  { %v794_v5 = vsub.f32 %v2008_v42, %v792_v47 }
 0x981   :  { %v796_v51 = vmul.f32 %v794_v5, %v794_v5 }
 0x983   :  { %v800_v52 = vsel %vm137_vm5, %v796_v51, 0.0 }
 0x984   :  { %801 = vadd.xlane.f32.xlu0 %v800_v52 }
 0x9ef   :  { %v799_v57 = vpop.xlane.xlu2 %798 }
 0x9f0   :  { %v803_v58 = vmul.f32 %v799_v57, %v1790_v48 }
 0x9f2   :  { %v805_v59 = vadd.f32 1e-05, %v803_v58 }
 0x9f4   :  { %1574 = vrsqrt.f32 %v805_v59  ;;  %vm813_vm13 = vweird.f32 %v805_v59 }
 0x9f7   :  { %v802_v60 = vpop.xlane.xlu0 %801 }
 0x9f8   :  { %v804_v61 = vmul.f32 %v802_v60, %v1790_v48 }
 0x9fa   :  { %v1575_v62 = vpop.eup %1574  ;;  %v806_v63 = vadd.f32 1e-05, %v804_v61 }
 0x9fb   :  { %v808_v0 = vmul.f32 %v1575_v62, %v805_v59  ;;  %vm814_vm11 = vweird.f32 %v1575_v62 }
 0x9fc   :  { %1576 = vrsqrt.f32 %v806_v63  ;;  %vm815_vm14 = vmor %vm813_vm13, %vm814_vm11  ;;  %vm823_vm2 = vweird.f32 %v806_v63 }
 0x9fd   :  { %v809_v2 = vmul.f32 %v1575_v62, %v808_v0 }
 0x9ff   :  { %v810_v3 = vmul.f32 0.5, %v809_v2 }
 0xa01   :  { %v811_v4 = vsub.f32 1.5, %v810_v3 }
 0xa02   :  { %v1577_v6 = vpop.eup %1576 }
 0xa03   :  { %v812_v7 = vmul.f32 %v1575_v62, %v811_v4  ;;  %v818_v8 = vmul.f32 %v1577_v6, %v806_v63  ;;  %vm824_vm15 = vweird.f32 %v1577_v6 }
 0xa04   :  { %vm825_vm6 = vmor %vm823_vm2, %vm824_vm15 }
 0xa05   :  { %v816_v9 = vsel %vm815_vm14, %v1575_v62, %v812_v7  ;;  %v819_v10 = vmul.f32 %v1577_v6, %v818_v8 }
 0xa06   :  { %v827_v11 = vmul.f32 %v816_v9, %v793_v1 }
 0xa07   :  { %v820_v23 = vmul.f32 0.5, %v819_v10 }
 0xa08   :  { %v830_v13 = vmul.f32 %v1526_v17, %v827_v11 }
 0xa09   :  { %v821_v14 = vsub.f32 1.5, %v820_v23 }
 0xa0a   :  { %v833_v15 = vadd.f32 %v1527_v12, %v830_v13 }
 0xa0b   :  { %v822_v16 = vmul.f32 %v1577_v6, %v821_v14 }
 0xa0c   :  { %1465 = vmatmul.msk.f32.vlgmr.msra.gmra.mxu3 %vm133_vm4, %v833_v15 }
 0xa0d   :  { %v826_v18 = vsel %vm825_vm6, %v1577_v6, %v822_v16 }
 0xa0e   :  { %v828_v19 = vmul.f32 %v826_v18, %v794_v5 }
 0xa10   :  { %v831_v20 = vmul.f32 %v1526_v17, %v828_v19 }
 0xa12   :  { %v834_v22 = vadd.f32 %v1527_v12, %v831_v20 }
 0xa14   :  { %1466 = vmatmul.msk.f32.gmra.mxu3 %vm133_vm4, %v834_v22 }
 0xa8f   :  { %v868_v25 = vpop.f32.mrf.mxu3 }
 0xa90   :  { %v869_v27 = vadd.f32 %v1528_v24, %v868_v25 }
 0xa92   :  { %995 = vrot.lane.b32.xlu0 %v869_v27, %s1637_s29  ;;  %999 = vrot.lane.b32.xlu2 %v869_v27, %s1638_s30 }
 0xa97   :  { %v871_v28 = vpop.f32.mrf.mxu3 }
 0xa98   :  { %v872_v29 = vadd.f32 %v1528_v24, %v871_v28 }
 0xa9a   :  { %876 = vrot.lane.b32.xlu0 %v869_v27, %s1639_s12  ;;  %1001 = vrot.lane.b32.xlu1 %v872_v29, %s1638_s30  ;;  %s1426_s30 = sshll.u32 %s2223_s11, 4  ;;  %s1427_s30 = int_to_ptr.hbm [resolvable:$true] %s1426_s30 }
 0xaa2   :  { %878 = vrot.lane.b32.xlu1 %v872_v29, %s1639_s12 }
 0xaec   :  { %v1000_v32 = vpop.permute.xlu2 %999 }
 0xb04   :  { %v996_v31 = vpop.permute.xlu0 %995 }
 0xb0c   :  { %v1002_v30 = vpop.permute.xlu1 %1001  ;;  %v877_v34 = vpop.permute.xlu0 %876 }
 0xb0d   :  { %1474 = vmatpush.xpose.msk.msrb.mxu2 %vm318_vm7, %v1002_v30 }
 0xb11   :  { %1475 = vmatpush.xpose.msk.msrb.mxu2 %vm318_vm7, %v1000_v32 }
 0xb14   :  { %v879_v33 = vpop.permute.xlu1 %878  ;;  %1476 = vmatmul.msk.f32.vlgmr.msrb.gmra.mxu2 %vm318_vm7, %v996_v31 }
 0xb15   :  { %1467 = vmatpush.xpose.msk.msra.mxu0 %vm318_vm7, %v879_v33 }
 0xb19   :  { %1468 = vmatpush.xpose.msk.msra.mxu0 %vm318_vm7, %v877_v34 }
 0xb1c   :  { %1469 = vmatmul.msk.f32.vlgmr.msra.gmra.mxu0 %vm318_vm7, %v869_v27 }
 0xb24   :  { %1470 = vmatmul.msk.f32.gmra.mxu0 %vm318_vm7, %v872_v29 }
 0xb97   :  { %v1028_v35 = vpop.f32.mrf.mxu2 }
 0xb98   :  { %v1029_v36 = vadd.f32 %v1028_v35, %v1869_v21 }
 0xb99   :  { %v905_v37 = vpop.f32.mrf.mxu0 }
 0xb9a   :  { %v906_v39 = vadd.f32 %v905_v37, %v1869_v21  ;;  %v1034_v40 = vsel %vm350_vm3, %v1029_v36, -inf }
 0xb9b   :  { %1035 = vmax.xlane.f32.xlu2 %v1034_v40 }
 0xb9c   :  { %v911_v41 = vsel %vm350_vm3, %v906_v39, -inf }
 0xb9d   :  { %912 = vmax.xlane.f32.xlu1 %v911_v41 }
 0xba1   :  { %v908_v43 = vpop.f32.mrf.mxu0 }
 0xba2   :  { %v909_v44 = vadd.f32 %v908_v43, %v1873_v26 }
 0xba4   :  { %v914_v45 = vsel %vm354_vm8, %v909_v44, -inf }
 0xbb3   :  { %1084 = vrot.lane.b32.xlu2 %v872_v29, %s1641_s13 }
 0xbb6   :  { %1082 = vrot.lane.b32.xlu1 %v869_v27, %s1641_s13 }
 0xbbb   :  { %959 = vrot.lane.b32.xlu2 %v869_v27, %s1642_s0 }
 0xbbe   :  { %997 = vrot.lane.b32.xlu1 %v872_v29, %s1637_s29 }
 0xbe8   :  { %915 = vmax.xlane.f32.xlu1 %v914_v45 }
 0xc0e   :  { %v1036_v21 = vpop.xlane.xlu2 %1035 }
 0xc0f   :  { %v1040_v1 = vsub.f32 %v1029_v36, %v1036_v21 }
 0xc10   :  { %v913_v46 = vpop.xlane.xlu1 %912 }
 0xc11   :  { %v1042_v49 = vmul.f32 1.442695, %v1040_v1  ;;  %v917_v50 = vsub.f32 %v906_v39, %v913_v46 }
 0xc13   :  { %1578 = vpow2.f32 %v1042_v49  ;;  %v919_v47 = vmul.f32 1.442695, %v917_v50  ;;  %v1484_v49 = vld [vmem:[%s2218_s6 + $0x38] sm:$0xff]  ;;  %v1483_v50 = vld [vmem:[%s2218_s6 + $0x30] sm:$0xff] }
 0xc14   :  { %1151 = vmatpush.msrb.mxu0 %v1484_v49  ;;  %v1498_v49 = vld [vmem:[%s2221_s9 + $0x50] sm:$0xff] }
 0xc15   :  { %1580 = vpow2.f32 %v919_v47 }
 0xc16   :  { %v1085_v5 = vpop.permute.xlu2 %1084  ;;  %1152 = vmatpush.msrb.mxu0 %v1483_v50 }
 0xc17   :  { %1478 = vmatpush.msk.msrb.mxu3 %vm411_vm12, %v1085_v5  ;;  %v1482_v5 = vld [vmem:[%s2218_s6 + $0x28] sm:$0xff] }
 0xc18   :  { %1153 = vmatpush.msrb.mxu0 %v1482_v5 }
 0xc19   :  { %v1579_v51 = vpop.eup %1578 }
 0xc1a   :  { %v1046_v52 = vsel %vm350_vm3, %v1579_v51, 0.0 }
 0xc1b   :  { %1047 = vadd.xlane.f32.xlu0 %v1046_v52  ;;  %v1581_v53 = vpop.eup %1580 }
 0xc1c   :  { %v923_v54 = vsel %vm350_vm3, %v1581_v53, 0.0 }
 0xc1e   :  { %v960_v25 = vpop.permute.xlu2 %959 }
 0xc23   :  { %924 = vadd.xlane.f32.xlu0 %v923_v54 }
 0xc28   :  { %v1083_v55 = vpop.permute.xlu1 %1082 }
 0xc29   :  { %1110 = vmatpush.msrb.mxu3 %v1083_v55 }
 0xc30   :  { %v998_v56 = vpop.permute.xlu1 %997 }
 0xc31   :  { %1477 = vmatmul.msk.f32.gmra.mxu2 %vm318_vm7, %v998_v56 }
 0xc37   :  { %961 = vrot.lane.b32.xlu0 %v872_v29, %s1642_s0 }
 0xc5b   :  { %v916_v57 = vpop.xlane.xlu1 %915 }
 0xc5c   :  { %v918_v58 = vsub.f32 %v909_v44, %v916_v57 }
 0xc5e   :  { %v921_v59 = vmul.f32 1.442695, %v918_v58 }
 0xc60   :  { %1582 = vpow2.f32 %v921_v59 }
 0xc66   :  { %v2070_v60 = vpop.eup %1582 }
 0xc67   :  { %v926_v61 = vsel %vm354_vm8, %v2070_v60, 0.0 }
 0xc68   :  { %927 = vadd.xlane.f32.xlu1 %v926_v61 }
 0xc8e   :  { %v1048_v62 = vpop.xlane.xlu0 %1047 }
 0xc8f   :  { %1584 = vrcp.f32 %v1048_v62  ;;  %v1063_v4 = vand.u32 2147483648, %v1048_v62  ;;  %v1061_v7 = vand.u32 2147483647, %v1048_v62  ;;  %vm1057_vm9 = vweird.f32 %v1048_v62 }
 0xc91   :  { %v1064_v9 = vor.u32 1.1754944e-38, %v1063_v4  ;;  %vm1062_vm11 = vcmp.eq.f32.partialorder %v1061_v7, 8.507059e+37  ;;  %v1529_v4 = vld [vmem:[%s2215_s3 + $0xc] ss:$0 sm:$0xff] }
 0xc95   :  { %v1585_v63 = vpop.eup %1584 }
 0xc96   :  { %v1053_v0 = vmul.f32 %v1585_v63, %v1048_v62  ;;  %v925_v2 = vpop.xlane.xlu0 %924  ;;  %vm1058_vm1 = vweird.f32 %v1585_v63 }
 0xc97   :  { %1586 = vrcp.f32 %v925_v2  ;;  %vm1059_vm10 = vmor %vm1057_vm9, %vm1058_vm1  ;;  %v940_v15 = vand.u32 2147483648, %v925_v2  ;;  %v938_v16 = vand.u32 2147483647, %v925_v2  ;;  %vm934_vm14 = vweird.f32 %v925_v2 }
 0xc98   :  { %v1054_v3 = vsub.f32 1.0, %v1053_v0 }
 0xc99   :  { %v941_v20 = vor.u32 1.1754944e-38, %v940_v15  ;;  %vm939_vm2 = vcmp.eq.f32.partialorder %v938_v16, 8.507059e+37  ;;  %v1490_v16 = vld [vmem:[%s2219_s7 + $0x38] sm:$0xff] }
 0xc9a   :  { %v1055_v6 = vmul.f32 %v1585_v63, %v1054_v3 }
 0xc9c   :  { %v1056_v8 = vadd.f32 %v1585_v63, %v1055_v6 }
 0xc9d   :  { %v1587_v17 = vpop.eup %1586 }
 0xc9e   :  { %v1060_v10 = vsel %vm1059_vm10, %v1585_v63, %v1056_v8  ;;  %v930_v11 = vmul.f32 %v1587_v17, %v925_v2  ;;  %vm935_vm13 = vweird.f32 %v1587_v17 }
 0xc9f   :  { %v1065_v12 = vsel %vm1062_vm11, %v1064_v9, %v1060_v10  ;;  %vm936_vm15 = vmor %vm934_vm14, %vm935_vm13 }
 0xca0   :  { %v931_v23 = vsub.f32 1.0, %v930_v11  ;;  %v1066_v13 = vmul.f32 %v1579_v51, %v1065_v12  ;;  %v1481_v51 = vld [vmem:[%s2218_s6 + $0x20] sm:$0xff] }
 0xca1   :  { %1154 = vmatpush.msrb.mxu0 %v1481_v51  ;;  %v1496_v51 = vld [vmem:[%s2221_s9 + $0x40] sm:$0xff] }
 0xca2   :  { %v932_v14 = vmul.f32 %v1587_v17, %v931_v23  ;;  %1479 = vmatmul.msk.f32.vlgmr.msrb.gmra.mxu3 %vm350_vm3, %v1066_v13 }
 0xca4   :  { %v933_v18 = vadd.f32 %v1587_v17, %v932_v14 }
 0xca6   :  { %v937_v19 = vsel %vm936_vm15, %v1587_v17, %v933_v18  ;;  %v1489_v18 = vld [vmem:[%s2219_s7 + $0x30] sm:$0xff] }
 0xca7   :  { %v942_v22 = vsel %vm939_vm2, %v941_v20, %v937_v19  ;;  %v1488_v19 = vld [vmem:[%s2219_s7 + $0x28] sm:$0xff]  ;;  %v1487_v20 = vld [vmem:[%s2219_s7 + $0x20] sm:$0xff] }
 0xca8   :  { %v943_v27 = vmul.f32 %v1581_v53, %v942_v22 }
 0xca9   :  { %v962_v24 = vpop.permute.xlu0 %961 }
 0xcaa   :  { %1471 = vmatpush.msk.msrb.mxu1 %vm411_vm12, %v962_v24 }
 0xcac   :  { %987 = vmatpush.msrb.mxu1 %v960_v25 }
 0xcad   :  { %1472 = vmatmul.msk.f32.vlgmr.msrb.gmra.mxu1 %vm350_vm3, %v943_v27 }
 0xcae   :  { %1248 = vmatpush.msra.mxu1 %v1490_v16 }
 0xcb0   :  { %1249 = vmatpush.msra.mxu1 %v1489_v18 }
 0xcb2   :  { %1250 = vmatpush.msra.mxu1 %v1488_v19 }
 0xcb4   :  { %v1031_v28 = vpop.f32.mrf.mxu2  ;;  %1251 = vmatpush.msra.mxu1 %v1487_v20 }
 0xcb5   :  { %v1032_v29 = vadd.f32 %v1031_v28, %v1873_v26 }
 0xcb7   :  { %v1037_v30 = vsel %vm354_vm8, %v1032_v29, -inf }
 0xcb8   :  { %1038 = vmax.xlane.f32.xlu0 %v1037_v30 }
 0xcdb   :  { %v928_v31 = vpop.xlane.xlu1 %927 }
 0xcdc   :  { %1588 = vrcp.f32 %v928_v31  ;;  %v955_v35 = vand.u32 2147483648, %v928_v31  ;;  %v953_v37 = vand.u32 2147483647, %v928_v31  ;;  %vm949_vm12 = vweird.f32 %v928_v31 }
 0xcde   :  { %v956_v40 = vor.u32 1.1754944e-38, %v955_v35  ;;  %vm954_vm9 = vcmp.eq.f32.partialorder %v953_v37, 8.507059e+37 }
 0xce2   :  { %v1589_v32 = vpop.eup %1588 }
 0xce3   :  { %v945_v33 = vmul.f32 %v1589_v32, %v928_v31  ;;  %vm950_vm6 = vweird.f32 %v1589_v32 }
 0xce4   :  { %vm951_vm1 = vmor %vm949_vm12, %vm950_vm6 }
 0xce5   :  { %v946_v34 = vsub.f32 1.0, %v945_v33  ;;  %v2128_v33 = vld [vmem:[%s2215_s3 + $0xd] ss:$0 sm:$0xff] }
 0xce7   :  { %v947_v36 = vmul.f32 %v1589_v32, %v946_v34 }
 0xce9   :  { %v948_v39 = vadd.f32 %v1589_v32, %v947_v36  ;;  %v2133_v36 = vld [vmem:[%s2215_s3 + $0xe] ss:$0 sm:$0xff] }
 0xceb   :  { %v952_v41 = vsel %vm951_vm1, %v1589_v32, %v948_v39  ;;  %vm2225_vm1 = vcmask 1040384  }
 0xcec   :  { %v957_v43 = vsel %vm954_vm9, %v956_v40, %v952_v41 }
 0xced   :  { %v958_v26 = vmul.f32 %v2070_v60, %v957_v43 }
 0xcef   :  { %1473 = vmatmul.msk.f32.gmra.mxu1 %vm350_vm3, %v958_v26 }
 0xd25   :  { %v1112_v44 = vpop.f32.mrf.mxu3 }
 0xd26   :  { %1120 = vrot.lane.b32.xlu2 %v1112_v44, %s1643_s18  ;;  %v1503_v44 = vld [vmem:[%s2221_s9 + $0x78] sm:$0xff] }
 0xd27   :  { %1324 = vmatpush.msra.mxu2 %v1503_v44 }
 0xd2a   :  { %v989_v52 = vpop.f32.mrf.mxu1 }
 0xd2b   :  { %v1039_v45 = vpop.xlane.xlu0 %1038 }
 0xd2c   :  { %v1041_v21 = vsub.f32 %v1032_v29, %v1039_v45  ;;  %v1502_v45 = vld [vmem:[%s2221_s9 + $0x70] sm:$0xff] }
 0xd2d   :  { %1325 = vmatpush.msra.mxu2 %v1502_v45 }
 0xd2e   :  { %v1044_v1 = vmul.f32 1.442695, %v1041_v21  ;;  %v1501_v21 = vld [vmem:[%s2221_s9 + $0x68] sm:$0xff] }
 0xd2f   :  { %1326 = vmatpush.msra.mxu2 %v1501_v21 }
 0xd30   :  { %1590 = vpow2.f32 %v1044_v1  ;;  %v1499_v1 = vld [vmem:[%s2221_s9 + $0x58] sm:$0xff] }
 0xd36   :  { %v1591_v46 = vpop.eup %1590 }
 0xd37   :  { %v1049_v47 = vsel %vm354_vm8, %v1591_v46, 0.0 }
 0xd4f   :  { %1050 = vadd.xlane.f32.xlu2 %v1049_v47  ;;  %v1497_v47 = vld [vmem:[%s2221_s9 + $0x48] sm:$0xff] }
 0xd6c   :  { %v992_v14 = vpop.f32.mrf.mxu1 }
 0xd80   :  { %v1121_v53 = vpop.permute.xlu2 %1120 }
 0xd81   :  { %v1126_v54 = vsel %vm318_vm7, %v989_v52, %v1121_v53 }
 0xd82   :  { %1485 = vmatmul.msk.f32.vlgmr.msrb.gmra.mxu0 %vm133_vm4, %v1126_v54 }
 0xdc2   :  { %v1051_v55 = vpop.xlane.xlu2 %1050 }
 0xdc3   :  { %1592 = vrcp.f32 %v1051_v55  ;;  %v1078_v59 = vand.u32 2147483648, %v1051_v55  ;;  %v1076_v61 = vand.u32 2147483647, %v1051_v55  ;;  %vm1072_vm10 = vweird.f32 %v1051_v55 }
 0xdc5   :  { %v1079_v63 = vor.u32 1.1754944e-38, %v1078_v59  ;;  %vm1077_vm13 = vcmp.eq.f32.partialorder %v1076_v61, 8.507059e+37 }
 0xdc9   :  { %v1593_v56 = vpop.eup %1592 }
 0xdca   :  { %v1068_v57 = vmul.f32 %v1593_v56, %v1051_v55  ;;  %vm1073_vm8 = vweird.f32 %v1593_v56 }
 0xdcb   :  { %vm1074_vm11 = vmor %vm1072_vm10, %vm1073_vm8 }
 0xdcc   :  { %v1069_v58 = vsub.f32 1.0, %v1068_v57 }
 0xdce   :  { %v1070_v60 = vmul.f32 %v1593_v56, %v1069_v58 }
 0xdd0   :  { %v1071_v62 = vadd.f32 %v1593_v56, %v1070_v60 }
 0xdd2   :  { %v1075_v0 = vsel %vm1074_vm11, %v1593_v56, %v1071_v62 }
 0xdd3   :  { %v1080_v2 = vsel %vm1077_vm13, %v1079_v63, %v1075_v0 }
 0xdd4   :  { %v1081_v3 = vmul.f32 %v1591_v46, %v1080_v2  ;;  %v2158_v46 = vld [vmem:[%s2220_s8 + $0x1] ss:$0 sm:$0xff] }
 0xdd6   :  { %1480 = vmatmul.msk.f32.gmra.mxu3 %vm350_vm3, %v1081_v3 }
 0xdff   :  { %v1156_v6 = vpop.f32.mrf.mxu0 }
 0xe00   :  { %v1162_v7 = vadd.f32 %v1156_v6, %v2003_v38 }
 0xe02   :  { %v2102_v8 = vadd.f32 %v1529_v4, %v1162_v7 }
 0xe04   :  { %v1170_v17 = vsel %vm133_vm4, %v2102_v8, 0.0 }
 0xe05   :  { %1171 = vadd.xlane.f32.xlu0 %v1170_v17 }
 0xe59   :  { %v1115_v9 = vpop.f32.mrf.mxu3 }
 0xe5a   :  { %1122 = vrot.lane.b32.xlu0 %v1115_v9, %s1643_s18 }
 0xe78   :  { %v1172_v10 = vpop.xlane.xlu0 %1171 }
 0xe79   :  { %v1176_v11 = vmul.f32 %v1172_v10, %v1790_v48  ;;  %v1533_v10 = vld [vmem:[%s2215_s3 + $0xf] ss:$0 sm:$0xff] }
 0xe7b   :  { %v1178_v12 = vsub.f32 %v2102_v8, %v1176_v11 }
 0xe7d   :  { %v1180_v23 = vmul.f32 %v1178_v12, %v1178_v12 }
 0xe7f   :  { %v1182_v13 = vsel %vm133_vm4, %v1180_v23, 0.0 }
 0xe80   :  { %1183 = vadd.xlane.f32.xlu2 %v1182_v13 }
 0xecc   :  { %v1123_v38 = vpop.permute.xlu0 %1122 }
 0xecd   :  { %v1127_v15 = vsel %vm318_vm7, %v992_v14, %v1123_v38 }
 0xece   :  { %1486 = vmatmul.msk.f32.gmra.mxu0 %vm133_vm4, %v1127_v15 }
 0xef3   :  { %v1184_v22 = vpop.xlane.xlu2 %1183 }
 0xef4   :  { %v1188_v24 = vmul.f32 %v1184_v22, %v1790_v48 }
 0xef6   :  { %v1190_v25 = vadd.f32 1e-05, %v1188_v24 }
 0xef8   :  { %1594 = vrsqrt.f32 %v1190_v25  ;;  %vm1198_vm3 = vweird.f32 %v1190_v25 }
 0xefe   :  { %v1595_v27 = vpop.eup %1594 }
 0xeff   :  { %v1193_v28 = vmul.f32 %v1595_v27, %v1190_v25  ;;  %vm1199_vm7 = vweird.f32 %v1595_v27 }
 0xf00   :  { %vm1200_vm14 = vmor %vm1198_vm3, %vm1199_vm7 }
 0xf01   :  { %v1194_v29 = vmul.f32 %v1595_v27, %v1193_v28 }
 0xf03   :  { %v1195_v30 = vmul.f32 0.5, %v1194_v29 }
 0xf05   :  { %v1196_v31 = vsub.f32 1.5, %v1195_v30 }
 0xf07   :  { %v1197_v32 = vmul.f32 %v1595_v27, %v1196_v31 }
 0xf09   :  { %v1201_v34 = vsel %vm1200_vm14, %v1595_v27, %v1197_v32 }
 0xf0a   :  { %v1212_v35 = vmul.f32 %v1201_v34, %v1178_v12 }
 0xf0c   :  { %v1215_v37 = vmul.f32 %v2128_v33, %v1212_v35 }
 0xf0e   :  { %v1218_v39 = vadd.f32 %v2133_v36, %v1215_v37 }
 0xf10   :  { %1492 = vmatmul.msk.f32.vlgmr.msra.gmra.mxu1 %vm133_vm4, %v1218_v39 }
 0xf4b   :  { %v1159_v40 = vpop.f32.mrf.mxu0 }
 0xf4c   :  { %v1163_v41 = vadd.f32 %v1159_v40, %v2008_v42  ;;  %v1500_v42 = vld [vmem:[%s2221_s9 + $0x60] sm:$0xff] }
 0xf4d   :  { %1327 = vmatpush.msra.mxu2 %v1500_v42 }
 0xf4e   :  { %v1167_v43 = vadd.f32 %v1529_v4, %v1163_v41 }
 0xf4f   :  { %1328 = vmatpush.msra.mxu2 %v1499_v1 }
 0xf50   :  { %v1173_v26 = vsel %vm137_vm5, %v1167_v43, 0.0 }
 0xf51   :  { %1174 = vadd.xlane.f32.xlu1 %v1173_v26  ;;  %1329 = vmatpush.msra.mxu2 %v1498_v49 }
 0xf53   :  { %1330 = vmatpush.msra.mxu2 %v1497_v47 }
 0xf55   :  { %1331 = vmatpush.msra.mxu2 %v1496_v51  ;;  %v1377_v51 = vld [vmem:[%s2222_s10 + $0x18] sm:$0xff] }
 0xf56   :  { %1393 = vmatpush.msra.mxu3 %v1377_v51 }
 0xf8d   :  { %v1253_v50 = vpop.f32.mrf.mxu1 }
 0xf8e   :  { %v1254_v5 = vadd.f32 %v2158_v46, %v1253_v50 }
 0xf90   :  { %v1494_v52 = vmul.f32 -1.702, %v1254_v5 }
 0xf92   :  { %v1263_v53 = vmul.f32 1.442695, %v1494_v52  ;;  %v1376_v52 = vld [vmem:[%s2222_s10 + $0x10] sm:$0xff] }
 0xf93   :  { %1394 = vmatpush.msra.mxu3 %v1376_v52 }
 0xf94   :  { %1596 = vpow2.f32 %v1263_v53  ;;  %v1375_v53 = vld [vmem:[%s2222_s10 + $0x8] sm:$0xff] }
 0xf95   :  { %1395 = vmatpush.msra.mxu3 %v1375_v53 }
 0xf9a   :  { %v1597_v54 = vpop.eup %1596 }
 0xf9b   :  { %v1267_v55 = vadd.f32 1.0, %v1597_v54  ;;  %v1374_v54 = vld [vmem:[%s2222_s10] sm:$0xff] }
 0xf9c   :  { %1396 = vmatpush.msra.mxu3 %v1374_v54 }
 0xf9d   :  { %1598 = vrcp.f32 %v1267_v55  ;;  %v1280_v59 = vand.u32 2147483648, %v1267_v55  ;;  %v1278_v61 = vand.u32 2147483647, %v1267_v55  ;;  %vm1274_vm2 = vweird.f32 %v1267_v55 }
 0xf9f   :  { %v1281_v63 = vor.u32 1.1754944e-38, %v1280_v59  ;;  %vm1279_vm12 = vcmp.eq.f32.partialorder %v1278_v61, 8.507059e+37 }
 0xfa3   :  { %v1599_v56 = vpop.eup %1598 }
 0xfa4   :  { %v1270_v57 = vmul.f32 %v1599_v56, %v1267_v55  ;;  %vm1275_vm15 = vweird.f32 %v1599_v56 }
 0xfa5   :  { %vm1276_vm6 = vmor %vm1274_vm2, %vm1275_vm15  ;;  %vm1402_vm15 = vcmask 123904  }
 0xfa6   :  { %v1271_v58 = vsub.f32 1.0, %v1270_v57 }
 0xfa8   :  { %v1272_v60 = vmul.f32 %v1599_v56, %v1271_v58 }
 0xfaa   :  { %v1273_v62 = vadd.f32 %v1599_v56, %v1272_v60 }
 0xfac   :  { %v1277_v0 = vsel %vm1276_vm6, %v1599_v56, %v1273_v62 }
 0xfad   :  { %v1282_v2 = vsel %vm1279_vm12, %v1281_v63, %v1277_v0  ;;  %v1534_v0 = vld [vmem:[%s2215_s3 + $0x2] ss:$0 sm:$0xff] }
 0xfae   :  { %v1299_v3 = vmul.f32 %v1282_v2, %v1254_v5 }
 0xfb0   :  { %1504 = vmatmul.msk.f32.vlgmr.msra.gmra.mxu2 %vm65_vm0, %v1299_v3 }
 0xfc4   :  { %v1175_v4 = vpop.xlane.xlu1 %1174 }
 0xfc5   :  { %v1177_v6 = vmul.f32 %v1175_v4, %v1790_v48 }
 0xfc7   :  { %v1179_v7 = vsub.f32 %v1167_v43, %v1177_v6 }
 0xfc9   :  { %v1181_v17 = vmul.f32 %v1179_v7, %v1179_v7 }
 0xfcb   :  { %v1185_v9 = vsel %vm137_vm5, %v1181_v17, 0.0 }
 0xfcc   :  { %1186 = vadd.xlane.f32.xlu2 %v1185_v9 }
0x1033   :  { %v1333_v11 = vpop.f32.mrf.mxu2 }
0x1034   :  { %v1338_v12 = vadd.f32 %v1333_v11, %v2102_v8 }
0x1036   :  { %v1341_v23 = vadd.f32 %v1533_v10, %v1338_v12 }
0x1038   :  { %v1343_v13 = vrot.slane %v1341_v23, 4 }
0x103a   :  { %v1345_v14 = vsel %vm2225_vm1, %v1341_v23, %v1343_v13 }
0x103b   :  { %v1348_v38 = vsel %vm137_vm5, %v1345_v14, 0.0 }
0x103c   :  { %1349 = vadd.xlane.f32.xlu1 %v1348_v38 }
0x103f   :  { %v1187_v15 = vpop.xlane.xlu2 %1186 }
0x1040   :  { %v1189_v16 = vmul.f32 %v1187_v15, %v1790_v48 }
0x1042   :  { %v1191_v18 = vadd.f32 1e-05, %v1189_v16 }
0x1044   :  { %1600 = vrsqrt.f32 %v1191_v18  ;;  %vm1208_vm8 = vweird.f32 %v1191_v18 }
0x104a   :  { %v1601_v19 = vpop.eup %1600 }
0x104b   :  { %v1203_v20 = vmul.f32 %v1601_v19, %v1191_v18  ;;  %vm1209_vm9 = vweird.f32 %v1601_v19 }
0x104c   :  { %vm1210_vm10 = vmor %vm1208_vm8, %vm1209_vm9 }
0x104d   :  { %v1204_v22 = vmul.f32 %v1601_v19, %v1203_v20 }
0x104f   :  { %v1205_v24 = vmul.f32 0.5, %v1204_v22 }
0x1051   :  { %v1206_v25 = vsub.f32 1.5, %v1205_v24 }
0x1053   :  { %v1207_v27 = vmul.f32 %v1601_v19, %v1206_v25 }
0x1055   :  { %v1211_v8 = vsel %vm1210_vm10, %v1601_v19, %v1207_v27 }
0x1056   :  { %v1213_v28 = vmul.f32 %v1211_v8, %v1179_v7 }
0x1058   :  { %v1216_v29 = vmul.f32 %v2128_v33, %v1213_v28 }
0x105a   :  { %v1219_v30 = vadd.f32 %v2133_v36, %v1216_v29 }
0x105c   :  { %1493 = vmatmul.msk.f32.gmra.mxu1 %vm133_vm4, %v1219_v30 }
0x10af   :  { %v1350_v31 = vpop.xlane.xlu1 %1349 }
0x10b0   :  { %v1351_v32 = vmul.f32 %v1350_v31, %v1790_v48 }
0x10b2   :  { %v1352_v34 = vsub.f32 %v1345_v14, %v1351_v32 }
0x10b4   :  { %v1353_v35 = vmul.f32 %v1352_v34, %v1352_v34 }
0x10b6   :  { %v1354_v37 = vsel %vm137_vm5, %v1353_v35, 0.0 }
0x10b7   :  { %1355 = vadd.xlane.f32.xlu2 %v1354_v37 }
0x10d9   :  { %v1256_v39 = vpop.f32.mrf.mxu1 }
0x10da   :  { %v1257_v40 = vadd.f32 %v2158_v46, %v1256_v39 }
0x10dc   :  { %v1495_v41 = vmul.f32 -1.702, %v1257_v40 }
0x10de   :  { %v1265_v43 = vmul.f32 1.442695, %v1495_v41 }
0x10e0   :  { %1602 = vpow2.f32 %v1265_v43 }
0x10e6   :  { %v1603_v26 = vpop.eup %1602 }
0x10e7   :  { %v1268_v33 = vadd.f32 1.0, %v1603_v26 }
0x10e9   :  { %1604 = vrcp.f32 %v1268_v33  ;;  %v1295_v21 = vand.u32 2147483648, %v1268_v33  ;;  %v1293_v1 = vand.u32 2147483647, %v1268_v33  ;;  %vm1289_vm13 = vweird.f32 %v1268_v33 }
0x10eb   :  { %v1296_v50 = vor.u32 1.1754944e-38, %v1295_v21  ;;  %vm1294_vm7 = vcmp.eq.f32.partialorder %v1293_v1, 8.507059e+37 }
0x10ef   :  { %v1605_v36 = vpop.eup %1604 }
0x10f0   :  { %v1285_v44 = vmul.f32 %v1605_v36, %v1268_v33  ;;  %vm1290_vm11 = vweird.f32 %v1605_v36 }
0x10f1   :  { %vm1291_vm5 = vmor %vm1289_vm13, %vm1290_vm11 }
0x10f2   :  { %v1286_v45 = vsub.f32 1.0, %v1285_v44 }
0x10f4   :  { %v1287_v42 = vmul.f32 %v1605_v36, %v1286_v45 }
0x10f6   :  { %v1288_v49 = vadd.f32 %v1605_v36, %v1287_v42 }
0x10f8   :  { %v1292_v47 = vsel %vm1291_vm5, %v1605_v36, %v1288_v49 }
0x10f9   :  { %v1297_v46 = vsel %vm1294_vm7, %v1296_v50, %v1292_v47 }
0x10fa   :  { %v1300_v5 = vmul.f32 %v1297_v46, %v1257_v40 }
0x10fc   :  { %1505 = vmatmul.msk.f32.gmra.mxu2 %vm65_vm0, %v1300_v5 }
0x112a   :  { %v1356_v55 = vpop.xlane.xlu2 %1355 }
0x112b   :  { %v1357_v56 = vmul.f32 %v1356_v55, %v1790_v48  ;;  %v1535_v48 = vld [vmem:[%s2215_s3 + $0x3] ss:$0 sm:$0xff]  ;;  %s1644_s3 = smov [#allocation2]  }
0x112c   :  { %s1424_s19 = sshll.u32 %s1644_s3, 4  ;;  %s1425_s19 = int_to_ptr.vmem [resolvable:$true] %s1424_s19 }
0x112d   :  { %v1358_v57 = vadd.f32 1e-05, %v1357_v56 }
0x112f   :  { %1606 = vrsqrt.f32 %v1358_v57  ;;  %vm1365_vm3 = vweird.f32 %v1358_v57 }
0x1135   :  { %v1607_v58 = vpop.eup %1606 }
0x1136   :  { %v1360_v59 = vmul.f32 %v1607_v58, %v1358_v57  ;;  %vm1366_vm0 = vweird.f32 %v1607_v58 }
0x1137   :  { %vm1367_vm14 = vmor %vm1365_vm3, %vm1366_vm0 }
0x1138   :  { %v1361_v60 = vmul.f32 %v1607_v58, %v1360_v59 }
0x113a   :  { %v1362_v61 = vmul.f32 0.5, %v1361_v60 }
0x113c   :  { %v1363_v62 = vsub.f32 1.5, %v1362_v61 }
0x113e   :  { %v1364_v63 = vmul.f32 %v1607_v58, %v1363_v62 }
0x1140   :  { %v1368_v2 = vsel %vm1367_vm14, %v1607_v58, %v1364_v63 }
0x1141   :  { %v1369_v3 = vmul.f32 %v1368_v2, %v1352_v34 }
0x1143   :  { %v1371_v4 = vmul.f32 %v1534_v0, %v1369_v3 }
0x1145   :  { %v1373_v6 = vadd.f32 %v1535_v48, %v1371_v4 }
0x1147   :  { %1506 = vmatmul.msk.f32.vlgmr.msra.gmra.mxu3 %vm133_vm4, %v1373_v6 }
0x117f   :  { %v1336_v7 = vpop.f32.mrf.mxu2 }
0x11ca   :  { %v1398_v17 = vpop.f32.mrf.mxu3 }
0x11cb   :  { %v1401_v9 = vmul.f32 %v1398_v17, %v1398_v17 }
0x11cd   :  { %v1403_v10 = vsel %vm1402_vm15, %v1401_v9, 0.0 }
0x11ce   :  { %1404 = vadd.xlane.f32.xlu0 %v1403_v10 }
0x1241   :  { %v1405_v11 = vpop.xlane.xlu0 %1404 }
0x1242   :  { %v1406_v12 = vadd.f32 1e-12, %v1405_v11 }
0x1244   :  { %1608 = vrsqrt.f32 %v1406_v12  ;;  %vm1413_vm6 = vweird.f32 %v1406_v12 }
0x124a   :  { %v1609_v23 = vpop.eup %1608 }
0x124b   :  { %v1408_v13 = vmul.f32 %v1609_v23, %v1406_v12  ;;  %vm1414_vm2 = vweird.f32 %v1609_v23 }
0x124c   :  { %vm1415_vm4 = vmor %vm1413_vm6, %vm1414_vm2 }
0x124d   :  { %v1409_v14 = vmul.f32 %v1609_v23, %v1408_v13 }
0x124f   :  { %v1410_v38 = vmul.f32 0.5, %v1409_v14 }
0x1251   :  { %v1411_v15 = vsub.f32 1.5, %v1410_v38 }
0x1253   :  { %v1412_v16 = vmul.f32 %v1609_v23, %v1411_v15 }
0x1255   :  { %v1416_v18 = vsel %vm1415_vm4, %v1609_v23, %v1412_v16 }
0x1256   :  { %v1417_v19 = vmul.f32 %v1416_v18, %v1398_v17 }
0x1258   :  { %1418 = vst.msk [vmem:[#allocation2] sm:$0x3] %vm1402_vm15, %v1417_v19 }
0x1259   :  { %1429 = dma.vmem_to_hbm [thread:$0]  %s1425_s19, 32, %s1427_s30, [#allocation3]  }
0x125a   :  { %1634 = dma.done.wait [#allocation3], 32  }
0x125b   :  { %1635 = vsyncadd [#allocation3], 4294967264 }
0x125c   :  { %1434 = vsyncpa [#allocation3], 1 }

</bundles_post_ra>
